<compile_context>
chip_gen: v7x
topology: tpu7x:2x2x1
jax: 0.10.0
libtpu: 0.0.40
codegen_flags: <defaults>
</compile_context>

<pallas_src>
import functools

import jax
import jax.numpy as jnp
from jax.experimental import pallas as pl
from jax.experimental.pallas import tpu as pltpu


# ----------------------------- Pallas kernels ------------------------------

def _gemm_bias_kernel(x_ref, w_ref, b_ref, o_ref, *, relu):
    y = jnp.dot(x_ref[...], w_ref[...], preferred_element_type=jnp.float32)
    y = y + b_ref[...]                      # b is (1, N); broadcasts over rows
    if relu:
        y = jnp.maximum(y, 0.0)
    o_ref[...] = y


def _fc_fused_kernel(x_ref, w1_ref, b1_ref, w2_ref, b2_ref, o_ref):
    # fc1 + ReLU (hidden stays in VMEM/vregs, never touches HBM)
    h = jnp.dot(x_ref[...], w1_ref[...], preferred_element_type=jnp.float32)
    h = jnp.maximum(h + b1_ref[...], 0.0)
    # fc2 (padded logit columns carry a -1e30 bias -> exp() underflows to 0)
    y = jnp.dot(h, w2_ref[...], preferred_element_type=jnp.float32)
    y = y + b2_ref[...]
    # numerically-stable log_softmax along dim=1
    m = jnp.max(y, axis=1, keepdims=True)
    z = y - m
    lse = jnp.log(jnp.sum(jnp.exp(z), axis=1, keepdims=True))
    o_ref[...] = z - lse


# ----------------------------- Pallas wrappers ------------------------------

def gemm_bias(x, w, b, *, relu=False, tile_m=None,
              vmem_budget_bytes=24 << 20):
    """(M,K) @ (K,N) + b[N] (+ optional fused ReLU) in a Pallas kernel.

    Default: a single grid step (whole M block) if it fits the VMEM budget;
    otherwise tile M (multiple of 8 sublanes).  The M grid axis is "parallel"
    (tiles are independent), so v7x can shard tiles across its TensorCores.
    """
    M, K = x.shape
    K2, N = w.shape
    assert K == K2

    def vmem_bytes(tm):
        # double-buffered x / w / b / out tiles, f32
        return 2 * 4 * (tm * K + K * N + N + tm * N)

    if tile_m is None:
        tile_m = M
        if vmem_bytes(M) > vmem_budget_bytes:
            for cand in (2048, 1024, 512, 256, 128):
                if M % cand == 0 and vmem_bytes(cand) <= vmem_budget_bytes:
                    tile_m = cand
                    break
    if M % tile_m != 0:
        tile_m = M                           # full-extent block is always legal

    kernel = functools.partial(_gemm_bias_kernel, relu=relu)
    return pl.pallas_call(
        kernel,
        out_shape=jax.ShapeDtypeStruct((M, N), jnp.float32),
        grid=(M // tile_m,),
        in_specs=[
            pl.BlockSpec((tile_m, K), lambda i: (i, 0)),
            pl.BlockSpec((K, N), lambda i: (0, 0)),
            pl.BlockSpec((1, N), lambda i: (0, 0)),
        ],
        out_specs=pl.BlockSpec((tile_m, N), lambda i: (i, 0)),
        compiler_params=pltpu.CompilerParams(
            dimension_semantics=("parallel",)),
    )(x, w, b.reshape(1, N))


def fc_fused(x, w1, b1, w2, b2):
    """Fused fc1 + ReLU + fc2 + log_softmax in a single Pallas kernel."""
    M = x.shape[0]
    N = w2.shape[1]
    return pl.pallas_call(
        _fc_fused_kernel,
        out_shape=jax.ShapeDtypeStruct((M, N), jnp.float32),
    )(x, w1, b1.reshape(1, -1), w2, b2.reshape(1, -1))


# ------------------------------- JAX glue -----------------------------------

def _pad2d(a, rows, cols, value=0.0):
    r, c = a.shape
    return jnp.pad(a, ((0, rows - r), (0, cols - c)), constant_values=value)


def _pad1d(a, n, value=0.0):
    return jnp.pad(a, (0, n - a.shape[0]), constant_values=value)


def im2col_nhwc(x, kh, kw, k_pad=None):
    """x: (B,H,W,C) -> patches (B*OH*OW, kh*kw*C), columns in (kh,kw,c) order.

    Optionally zero-pads the K axis to `k_pad` so the GEMM lane dim is dense.
    """
    B, H, W, C = x.shape
    OH, OW = H - kh + 1, W - kw + 1
    cols = []
    for i in range(kh):
        for j in range(kw):
            cols.append(x[:, i:i + OH, j:j + OW, :])       # (B,OH,OW,C)
    p = jnp.stack(cols, axis=3)                            # (B,OH,OW,kh*kw,C)
    p = p.reshape(B * OH * OW, kh * kw * C)
    K = kh * kw * C
    if k_pad is not None and k_pad > K:
        p = jnp.pad(p, ((0, 0), (0, k_pad - K)))
    return p, (B, OH, OW)


def adaptive_max_pool2d_nhwc(x, out_size):
    """Matches F.adaptive_max_pool2d when H % out_size == 0 (true here: 24->12)."""
    B, H, W, C = x.shape
    assert H % out_size == 0 and W % out_size == 0
    kh, kw = H // out_size, W // out_size
    return jnp.max(x.reshape(B, out_size, kh, out_size, kw, C), axis=(2, 4))


def max_pool2_nhwc(x):
    B, H, W, C = x.shape
    return jnp.max(x.reshape(B, H // 2, 2, W // 2, 2, C), axis=(2, 4))


# ------------------------------ Net forward ---------------------------------

def init_params(key):
    """PyTorch-default-style uniform(-1/sqrt(fan_in), 1/sqrt(fan_in)) init,
    in PyTorch weight layouts (OC,C,KH,KW) / (out,in)."""
    ks = jax.random.split(key, 8)

    def u(k, shape, fan_in):
        bound = 1.0 / jnp.sqrt(fan_in)
        return jax.random.uniform(k, shape, jnp.float32, -bound, bound)

    return {
        "conv1_w": u(ks[0], (10, 3, 5, 5), 3 * 5 * 5),
        "conv1_b": u(ks[1], (10,), 3 * 5 * 5),
        "conv2_w": u(ks[2], (20, 10, 5, 5), 10 * 5 * 5),
        "conv2_b": u(ks[3], (20,), 10 * 5 * 5),
        "fc1_w": u(ks[4], (50, 320), 320),
        "fc1_b": u(ks[5], (50,), 320),
        "fc2_w": u(ks[6], (10, 50), 50),
        "fc2_b": u(ks[7], (10,), 50),
    }


def net_forward(x, params):
    B = x.shape[0]

    # One transpose of the small input to NHWC; activations stay NHWC after.
    xh = x.transpose(0, 2, 3, 1)                              # (B,28,28,3)

    # conv1: 3 -> 10, k=5.  im2col GEMM, K 75->128, OC 10->128, ReLU fused.
    # relu(adaptive_max_pool(y)) == adaptive_max_pool(relu(y)).
    p1, (_, oh1, ow1) = im2col_nhwc(xh, 5, 5, k_pad=128)      # (B*576,128)
    w1 = params["conv1_w"].transpose(0, 2, 3, 1).reshape(10, 75).T
    w1 = _pad2d(w1, 128, 128)
    b1 = _pad1d(params["conv1_b"], 128)
    y1 = gemm_bias(p1, w1, b1, relu=True)                     # (B*576,128)
    y1 = y1[:, :10].reshape(B, oh1, ow1, 10)                  # NHWC, no transpose
    x1 = adaptive_max_pool2d_nhwc(y1, 12)                     # (B,12,12,10)

    # conv2: 10 -> 20, k=5.  K 250->256, OC 20->128, ReLU fused.
    p2, (_, oh2, ow2) = im2col_nhwc(x1, 5, 5, k_pad=256)      # (B*64,256)
    w2 = params["conv2_w"].transpose(0, 2, 3, 1).reshape(20, 250).T
    w2 = _pad2d(w2, 256, 128)
    b2 = _pad1d(params["conv2_b"], 128)
    y2 = gemm_bias(p2, w2, b2, relu=True)                     # (B*64,128)
    y2 = y2[:, :20].reshape(B, oh2, ow2, 20)
    x2 = max_pool2_nhwc(y2)                                   # (B,4,4,20)

    # Flatten in HWC order; permute fc1 columns (PyTorch layout is CHW) to
    # match, so the result equals the PyTorch x.view(-1, 320) @ fc1_w.T path.
    xf = x2.reshape(B, 320)
    fw1 = (params["fc1_w"].reshape(50, 20, 4, 4)
           .transpose(0, 2, 3, 1).reshape(50, 320).T)         # (320,50)
    fw1 = _pad2d(fw1, 320, 128)                               # hidden 50->128 (zeros)
    fb1 = _pad1d(params["fc1_b"], 128)
    fw2 = _pad2d(params["fc2_w"].T, 128, 128)                 # (50,10)->(128,128)
    fb2 = _pad1d(params["fc2_b"], 128, value=-1e30)           # mask padded logits

    out = fc_fused(xf, fw1, fb1, fw2, fb2)                    # (B,128)
    return out[:, :10]


# --------------------------------- main --------------------------------------

if __name__ == "__main__":
    key = jax.random.PRNGKey(0)
    k_param, k_x = jax.random.split(key)

    params = init_params(k_param)
    x = jax.random.normal(k_x, (2, 3, 28, 28), jnp.float32)   # NCHW, like PyTorch

    out = jax.jit(net_forward)(x, params)
    out = jax.block_until_ready(out)

    assert out.shape == (2, 10)
    # log_softmax rows must exponentiate-sum to 1
    assert bool(jnp.allclose(jnp.sum(jnp.exp(out), axis=1), 1.0, atol=1e-4))
    print("KERNEL_OK")
</pallas_src>

<mosaic_0001>
module attributes {stable_mosaic.version = 11 : i64} {
  func.func @_gemm_bias_kernel(%arg0: i32, %arg1: memref<1152x128xf32, #tpu.memory_space<vmem>>, %arg2: memref<128x128xf32, #tpu.memory_space<vmem>>, %arg3: memref<1x128xf32, #tpu.memory_space<vmem>>, %arg4: memref<1152x128xf32, #tpu.memory_space<vmem>>) attributes {dimension_semantics = [#tpu.dimension_semantics<parallel>], iteration_bounds = array<i64: 1>, scalar_prefetch = 0 : i64, scratch_operands = 0 : i64, tpu.core_type = #tpu.core_type<tc>, window_params = [{transform_indices = @transform_0, window_bounds = array<i64: 1152, 128>}, {pipeline_mode = #tpu.pipeline_mode<synchronous>, transform_indices = @transform_1, window_bounds = array<i64: 128, 128>}, {pipeline_mode = #tpu.pipeline_mode<synchronous>, transform_indices = @transform_2, window_bounds = array<i64: 1, 128>}, {transform_indices = @transform_3, window_bounds = array<i64: 1152, 128>}]} {
    %c0 = arith.constant 0 : index
    %c0_0 = arith.constant 0 : index
    %0 = vector.load %arg1[%c0, %c0_0] : memref<1152x128xf32, #tpu.memory_space<vmem>>, vector<1152x128xf32>
    %c0_1 = arith.constant 0 : index
    %c0_2 = arith.constant 0 : index
    %1 = vector.load %arg2[%c0_1, %c0_2] : memref<128x128xf32, #tpu.memory_space<vmem>>, vector<128x128xf32>
    %cst = arith.constant dense<0.000000e+00> : vector<1152x128xf32>
    %2 = tpu.matmul %0, %1, %cst {dimension_numbers = #tpu.dot_dimension_numbers<[1], [0], [0], [1], [0, 0, 1, 1], [], []>} : vector<1152x128xf32>, vector<128x128xf32>, vector<1152x128xf32> -> vector<1152x128xf32>
    %c0_3 = arith.constant 0 : index
    %c0_4 = arith.constant 0 : index
    %3 = vector.load %arg3[%c0_3, %c0_4] : memref<1x128xf32, #tpu.memory_space<vmem>>, vector<1x128xf32>
    %4 = vector.broadcast %3 : vector<1x128xf32> to vector<1152x128xf32>
    %5 = arith.addf %2, %4 : vector<1152x128xf32>
    %cst_5 = arith.constant 0.000000e+00 : f32
    %6 = vector.broadcast %cst_5 : f32 to vector<1152x128xf32>
    %7 = arith.maximumf %5, %6 : vector<1152x128xf32>
    %c0_6 = arith.constant 0 : index
    %c0_7 = arith.constant 0 : index
    %8 = vector.load %arg4[%c0_6, %c0_7] : memref<1152x128xf32, #tpu.memory_space<vmem>>, vector<1152x128xf32>
    tpu.vector_store %arg4[%c0_6, %c0_7], %7 {strides = array<i32>} : memref<1152x128xf32, #tpu.memory_space<vmem>>, vector<1152x128xf32>,
    return
  }
  func.func @transform_0(%arg0: i32) -> (i32, i32) {
    %c0_i32 = arith.constant 0 : i32
    %c0_i32_0 = arith.constant 0 : i32
    return %arg0, %c0_i32 : i32, i32
  }
  func.func @transform_1(%arg0: i32) -> (i32, i32) {
    %c0_i32 = arith.constant 0 : i32
    %c0_i32_0 = arith.constant 0 : i32
    %c0_i32_1 = arith.constant 0 : i32
    return %c0_i32, %c0_i32_0 : i32, i32
  }
  func.func @transform_2(%arg0: i32) -> (i32, i32) {
    %c0_i32 = arith.constant 0 : i32
    %c0_i32_0 = arith.constant 0 : i32
    %c0_i32_1 = arith.constant 0 : i32
    return %c0_i32, %c0_i32_0 : i32, i32
  }
  func.func @transform_3(%arg0: i32) -> (i32, i32) {
    %c0_i32 = arith.constant 0 : i32
    %c0_i32_0 = arith.constant 0 : i32
    return %arg0, %c0_i32 : i32, i32
  }
}

module attributes {stable_mosaic.version = 11 : i64} {
  func.func @_gemm_bias_kernel(%arg0: i32, %arg1: memref<128x256xf32, #tpu.memory_space<vmem>>, %arg2: memref<256x128xf32, #tpu.memory_space<vmem>>, %arg3: memref<1x128xf32, #tpu.memory_space<vmem>>, %arg4: memref<128x128xf32, #tpu.memory_space<vmem>>) attributes {dimension_semantics = [#tpu.dimension_semantics<parallel>], iteration_bounds = array<i64: 1>, scalar_prefetch = 0 : i64, scratch_operands = 0 : i64, tpu.core_type = #tpu.core_type<tc>, window_params = [{transform_indices = @transform_0, window_bounds = array<i64: 128, 256>}, {pipeline_mode = #tpu.pipeline_mode<synchronous>, transform_indices = @transform_1, window_bounds = array<i64: 256, 128>}, {pipeline_mode = #tpu.pipeline_mode<synchronous>, transform_indices = @transform_2, window_bounds = array<i64: 1, 128>}, {transform_indices = @transform_3, window_bounds = array<i64: 128, 128>}]} {
    %c0 = arith.constant 0 : index
    %c0_0 = arith.constant 0 : index
    %0 = vector.load %arg1[%c0, %c0_0] : memref<128x256xf32, #tpu.memory_space<vmem>>, vector<128x256xf32>
    %c0_1 = arith.constant 0 : index
    %c0_2 = arith.constant 0 : index
    %1 = vector.load %arg2[%c0_1, %c0_2] : memref<256x128xf32, #tpu.memory_space<vmem>>, vector<256x128xf32>
    %cst = arith.constant dense<0.000000e+00> : vector<128x128xf32>
    %2 = tpu.matmul %0, %1, %cst {dimension_numbers = #tpu.dot_dimension_numbers<[1], [0], [0], [1], [0, 0, 1, 1], [], []>} : vector<128x256xf32>, vector<256x128xf32>, vector<128x128xf32> -> vector<128x128xf32>
    %c0_3 = arith.constant 0 : index
    %c0_4 = arith.constant 0 : index
    %3 = vector.load %arg3[%c0_3, %c0_4] : memref<1x128xf32, #tpu.memory_space<vmem>>, vector<1x128xf32>
    %4 = vector.broadcast %3 : vector<1x128xf32> to vector<128x128xf32>
    %5 = arith.addf %2, %4 : vector<128x128xf32>
    %cst_5 = arith.constant 0.000000e+00 : f32
    %6 = vector.broadcast %cst_5 : f32 to vector<128x128xf32>
    %7 = arith.maximumf %5, %6 : vector<128x128xf32>
    %c0_6 = arith.constant 0 : index
    %c0_7 = arith.constant 0 : index
    %8 = vector.load %arg4[%c0_6, %c0_7] : memref<128x128xf32, #tpu.memory_space<vmem>>, vector<128x128xf32>
    tpu.vector_store %arg4[%c0_6, %c0_7], %7 {strides = array<i32>} : memref<128x128xf32, #tpu.memory_space<vmem>>, vector<128x128xf32>,
    return
  }
  func.func @transform_0(%arg0: i32) -> (i32, i32) {
    %c0_i32 = arith.constant 0 : i32
    %c0_i32_0 = arith.constant 0 : i32
    return %arg0, %c0_i32 : i32, i32
  }
  func.func @transform_1(%arg0: i32) -> (i32, i32) {
    %c0_i32 = arith.constant 0 : i32
    %c0_i32_0 = arith.constant 0 : i32
    %c0_i32_1 = arith.constant 0 : i32
    return %c0_i32, %c0_i32_0 : i32, i32
  }
  func.func @transform_2(%arg0: i32) -> (i32, i32) {
    %c0_i32 = arith.constant 0 : i32
    %c0_i32_0 = arith.constant 0 : i32
    %c0_i32_1 = arith.constant 0 : i32
    return %c0_i32, %c0_i32_0 : i32, i32
  }
  func.func @transform_3(%arg0: i32) -> (i32, i32) {
    %c0_i32 = arith.constant 0 : i32
    %c0_i32_0 = arith.constant 0 : i32
    return %arg0, %c0_i32 : i32, i32
  }
}

module attributes {stable_mosaic.version = 11 : i64} {
  func.func @_fc_fused_kernel(%arg0: memref<2x320xf32, #tpu.memory_space<vmem>>, %arg1: memref<320x128xf32, #tpu.memory_space<vmem>>, %arg2: memref<1x128xf32, #tpu.memory_space<vmem>>, %arg3: memref<128x128xf32, #tpu.memory_space<vmem>>, %arg4: memref<1x128xf32, #tpu.memory_space<vmem>>, %arg5: memref<2x128xf32, #tpu.memory_space<vmem>>) attributes {dimension_semantics = [], scalar_prefetch = 0 : i64, scratch_operands = 0 : i64, tpu.core_type = #tpu.core_type<tc>} {
    %c0 = arith.constant 0 : index
    %c0_0 = arith.constant 0 : index
    %0 = vector.load %arg0[%c0, %c0_0] : memref<2x320xf32, #tpu.memory_space<vmem>>, vector<2x320xf32>
    %c0_1 = arith.constant 0 : index
    %c0_2 = arith.constant 0 : index
    %1 = vector.load %arg1[%c0_1, %c0_2] : memref<320x128xf32, #tpu.memory_space<vmem>>, vector<320x128xf32>
    %cst = arith.constant dense<0.000000e+00> : vector<2x128xf32>
    %2 = tpu.matmul %0, %1, %cst {dimension_numbers = #tpu.dot_dimension_numbers<[1], [0], [0], [1], [0, 0, 1, 1], [], []>} : vector<2x320xf32>, vector<320x128xf32>, vector<2x128xf32> -> vector<2x128xf32>
    %c0_3 = arith.constant 0 : index
    %c0_4 = arith.constant 0 : index
    %3 = vector.load %arg2[%c0_3, %c0_4] : memref<1x128xf32, #tpu.memory_space<vmem>>, vector<1x128xf32>
    %4 = vector.broadcast %3 : vector<1x128xf32> to vector<2x128xf32>
    %5 = arith.addf %2, %4 : vector<2x128xf32>
    %cst_5 = arith.constant 0.000000e+00 : f32
    %6 = vector.broadcast %cst_5 : f32 to vector<2x128xf32>
    %7 = arith.maximumf %5, %6 : vector<2x128xf32>
    %c0_6 = arith.constant 0 : index
    %c0_7 = arith.constant 0 : index
    %8 = vector.load %arg3[%c0_6, %c0_7] : memref<128x128xf32, #tpu.memory_space<vmem>>, vector<128x128xf32>
    %cst_8 = arith.constant dense<0.000000e+00> : vector<2x128xf32>
    %9 = tpu.matmul %7, %8, %cst_8 {dimension_numbers = #tpu.dot_dimension_numbers<[1], [0], [0], [1], [0, 0, 1, 1], [], []>} : vector<2x128xf32>, vector<128x128xf32>, vector<2x128xf32> -> vector<2x128xf32>
    %c0_9 = arith.constant 0 : index
    %c0_10 = arith.constant 0 : index
    %10 = vector.load %arg4[%c0_9, %c0_10] : memref<1x128xf32, #tpu.memory_space<vmem>>, vector<1x128xf32>
    %11 = vector.broadcast %10 : vector<1x128xf32> to vector<2x128xf32>
    %12 = arith.addf %9, %11 : vector<2x128xf32>
    %cst_11 = arith.constant dense<0xFF800000> : vector<2xf32>
    %13 = vector.multi_reduction <maximumf>, %12, %cst_11 [1] : vector<2x128xf32> to vector<2xf32>
    %14 = vector.shape_cast %13 : vector<2xf32> to vector<2x1xf32>
    %15 = vector.broadcast %14 : vector<2x1xf32> to vector<2x128xf32>
    %16 = arith.subf %12, %15 : vector<2x128xf32>
    %17 = math.exp %16 : vector<2x128xf32>
    %cst_12 = arith.constant dense<0.000000e+00> : vector<2xf32>
    %18 = vector.multi_reduction <add>, %17, %cst_12 [1] : vector<2x128xf32> to vector<2xf32>
    %19 = vector.shape_cast %18 : vector<2xf32> to vector<2x1xf32>
    %20 = math.log %19 : vector<2x1xf32>
    %21 = vector.broadcast %20 : vector<2x1xf32> to vector<2x128xf32>
    %22 = arith.subf %16, %21 : vector<2x128xf32>
    %c0_13 = arith.constant 0 : index
    %c0_14 = arith.constant 0 : index
    %23 = vector.load %arg5[%c0_13, %c0_14] : memref<2x128xf32, #tpu.memory_space<vmem>>, vector<2x128xf32>
    tpu.vector_store %arg5[%c0_13, %c0_14], %22 {strides = array<i32>} : memref<2x128xf32, #tpu.memory_space<vmem>>, vector<2x128xf32>,
    return
  }
}

</mosaic_0001>

<bundles_post_ra>
// kernel: net_forward.3
= control target key start
LH: loop header
LB: loop body
LE: loop exit
PB: predicated region body
PF: predicated region fallthrough
CT: control target
= control target key end

     0   :  { %s2784_s1 = inlined_call_operand.vmem [shape: f32[128,128], index: 1, kind: input, shape index: {}]   ;;  %s2785_s0 = inlined_call_operand.vmem [shape: f32[1152,128], index: 0, kind: input, shape index: {}]   ;;  %s2786_s2 = inlined_call_operand.vmem [shape: f32[1,128], index: 2, kind: input, shape index: {}]   ;;  %s2787_s3 = inlined_call_operand.vmem [shape: f32[1152,128], index: 3, kind: output, shape index: {}]  }
   0x1   :  { %v158_v0 = vld [vmem:[%s2784_s1] sm:$0xff]  ;;  %v159_v1 = vld [vmem:[%s2784_s1 + $0x8] sm:$0xff]  ;;  %v160_v2 = vld [vmem:[%s2784_s1 + $0x10] sm:$0xff] }
   0x2   :  { %v1667_v3 = vpack.c.bf16 %v159_v1, %v158_v0  ;;  %v161_v4 = vld [vmem:[%s2784_s1 + $0x18] sm:$0xff]  ;;  %v162_v6 = vld [vmem:[%s2784_s1 + $0x20] sm:$0xff]  ;;  %v163_v7 = vld [vmem:[%s2784_s1 + $0x28] sm:$0xff] }
   0x3   :  { %v1671_v5 = vpack.c.bf16 %v161_v4, %v160_v2  ;;  %v1675_v8 = vpack.c.bf16 %v163_v7, %v162_v6  ;;  %v14_v9 = vld [vmem:[%s2785_s0] sm:$0xff]  ;;  %v164_v11 = vld [vmem:[%s2784_s1 + $0x30] sm:$0xff]  ;;  %v165_v12 = vld [vmem:[%s2784_s1 + $0x38] sm:$0xff] }
   0x4   :  { %1668 = vmatprep.subr.bf16.mxu0 %v1667_v3  ;;  %1699 = vmatprep.subr.bf16.mxu1 %v1667_v3  ;;  %v86_v10 = vld [vmem:[%s2785_s0 + $0x240] sm:$0xff]  ;;  %v1679_v13 = vpack.c.bf16 %v165_v12, %v164_v11  ;;  %v167_v15 = vld [vmem:[%s2784_s1 + $0x48] sm:$0xff]  ;;  %v168_v17 = vld [vmem:[%s2784_s1 + $0x50] sm:$0xff] }
   0x5   :  { %1670 = vmatpush3.bf16.msra.mxu0 %v1667_v3  ;;  %1707 = vmatpush3.bf16.msra.mxu1 %v1667_v3  ;;  %v166_v14 = vld [vmem:[%s2784_s1 + $0x40] sm:$0xff]  ;;  %v169_v18 = vld [vmem:[%s2784_s1 + $0x58] sm:$0xff]  ;;  %v171_v21 = vld [vmem:[%s2784_s1 + $0x68] sm:$0xff] }
   0x6   :  { %1672 = vmatprep.subr.bf16.mxu0 %v1671_v5  ;;  %1700 = vmatprep.subr.bf16.mxu1 %v1671_v5  ;;  %v1683_v16 = vpack.c.bf16 %v167_v15, %v166_v14  ;;  %v1687_v19 = vpack.c.bf16 %v169_v18, %v168_v17  ;;  %v170_v20 = vld [vmem:[%s2784_s1 + $0x60] sm:$0xff]  ;;  %v172_v23 = vld [vmem:[%s2784_s1 + $0x70] sm:$0xff]  ;;  %v173_v24 = vld [vmem:[%s2784_s1 + $0x78] sm:$0xff] }
   0x7   :  { %1451 = vmatprep.mubr.f32.mxu0 %v14_v9  ;;  %1559 = vmatprep.mubr.f32.mxu1 %v86_v10  ;;  %v1691_v22 = vpack.c.bf16 %v171_v21, %v170_v20  ;;  %v1695_v25 = vpack.c.bf16 %v173_v24, %v172_v23  ;;  %v15_v26 = vld [vmem:[%s2785_s0 + $0x8] sm:$0xff]  ;;  %v16_v28 = vld [vmem:[%s2785_s0 + $0x10] sm:$0xff]  ;;  %v17_v30 = vld [vmem:[%s2785_s0 + $0x18] sm:$0xff] }
   0x8   :  { %v87_v27 = vld [vmem:[%s2785_s0 + $0x248] sm:$0xff]  ;;  %v88_v29 = vld [vmem:[%s2785_s0 + $0x250] sm:$0xff]  ;;  %v89_v31 = vld [vmem:[%s2785_s0 + $0x258] sm:$0xff] }
   0x9   :  { %1674 = vmatpush3.bf16.msra.mxu0 %v1671_v5  ;;  %1708 = vmatpush3.bf16.msra.mxu1 %v1671_v5  ;;  %v18_v32 = vld [vmem:[%s2785_s0 + $0x20] sm:$0xff]  ;;  %v19_v34 = vld [vmem:[%s2785_s0 + $0x28] sm:$0xff]  ;;  %v20_v36 = vld [vmem:[%s2785_s0 + $0x30] sm:$0xff] }
   0xa   :  { %1676 = vmatprep.subr.bf16.mxu0 %v1675_v8  ;;  %1701 = vmatprep.subr.bf16.mxu1 %v1675_v8  ;;  %v90_v33 = vld [vmem:[%s2785_s0 + $0x260] sm:$0xff]  ;;  %v91_v35 = vld [vmem:[%s2785_s0 + $0x268] sm:$0xff]  ;;  %v92_v37 = vld [vmem:[%s2785_s0 + $0x270] sm:$0xff] }
   0xb   :  { %v21_v38 = vld [vmem:[%s2785_s0 + $0x38] sm:$0xff]  ;;  %v22_v40 = vld [vmem:[%s2785_s0 + $0x40] sm:$0xff]  ;;  %v23_v42 = vld [vmem:[%s2785_s0 + $0x48] sm:$0xff] }
   0xc   :  { %v93_v39 = vld [vmem:[%s2785_s0 + $0x278] sm:$0xff]  ;;  %v94_v41 = vld [vmem:[%s2785_s0 + $0x280] sm:$0xff]  ;;  %v95_v43 = vld [vmem:[%s2785_s0 + $0x288] sm:$0xff] }
   0xd   :  { %1678 = vmatpush3.bf16.msra.mxu0 %v1675_v8  ;;  %1709 = vmatpush3.bf16.msra.mxu1 %v1675_v8  ;;  %v24_v44 = vld [vmem:[%s2785_s0 + $0x50] sm:$0xff]  ;;  %v25_v46 = vld [vmem:[%s2785_s0 + $0x58] sm:$0xff]  ;;  %v26_v48 = vld [vmem:[%s2785_s0 + $0x60] sm:$0xff] }
   0xe   :  { %1680 = vmatprep.subr.bf16.mxu0 %v1679_v13  ;;  %1702 = vmatprep.subr.bf16.mxu1 %v1679_v13  ;;  %v96_v45 = vld [vmem:[%s2785_s0 + $0x290] sm:$0xff]  ;;  %v97_v47 = vld [vmem:[%s2785_s0 + $0x298] sm:$0xff]  ;;  %v98_v49 = vld [vmem:[%s2785_s0 + $0x2a0] sm:$0xff] }
   0xf   :  { %v27_v50 = vld [vmem:[%s2785_s0 + $0x68] sm:$0xff]  ;;  %v28_v52 = vld [vmem:[%s2785_s0 + $0x70] sm:$0xff]  ;;  %v29_v54 = vld [vmem:[%s2785_s0 + $0x78] sm:$0xff] }
  0x10   :  { %v99_v51 = vld [vmem:[%s2785_s0 + $0x2a8] sm:$0xff]  ;;  %v100_v53 = vld [vmem:[%s2785_s0 + $0x2b0] sm:$0xff]  ;;  %v101_v55 = vld [vmem:[%s2785_s0 + $0x2b8] sm:$0xff] }
  0x11   :  { %1682 = vmatpush3.bf16.msra.mxu0 %v1679_v13  ;;  %1710 = vmatpush3.bf16.msra.mxu1 %v1679_v13  ;;  %v30_v56 = vld [vmem:[%s2785_s0 + $0x80] sm:$0xff]  ;;  %v31_v58 = vld [vmem:[%s2785_s0 + $0x88] sm:$0xff]  ;;  %v32_v60 = vld [vmem:[%s2785_s0 + $0x90] sm:$0xff] }
  0x12   :  { %1684 = vmatprep.subr.bf16.mxu0 %v1683_v16  ;;  %1703 = vmatprep.subr.bf16.mxu1 %v1683_v16  ;;  %v102_v57 = vld [vmem:[%s2785_s0 + $0x2c0] sm:$0xff]  ;;  %v103_v59 = vld [vmem:[%s2785_s0 + $0x2c8] sm:$0xff]  ;;  %v104_v61 = vld [vmem:[%s2785_s0 + $0x2d0] sm:$0xff] }
  0x13   :  { %v33_v62 = vld [vmem:[%s2785_s0 + $0x98] sm:$0xff]  ;;  %v34_v0 = vld [vmem:[%s2785_s0 + $0xa0] sm:$0xff]  ;;  %v35_v2 = vld [vmem:[%s2785_s0 + $0xa8] sm:$0xff] }
  0x14   :  { %v105_v63 = vld [vmem:[%s2785_s0 + $0x2d8] sm:$0xff]  ;;  %v106_v1 = vld [vmem:[%s2785_s0 + $0x2e0] sm:$0xff]  ;;  %v107_v3 = vld [vmem:[%s2785_s0 + $0x2e8] sm:$0xff] }
  0x15   :  { %1686 = vmatpush3.bf16.msra.mxu0 %v1683_v16  ;;  %1711 = vmatpush3.bf16.msra.mxu1 %v1683_v16  ;;  %v36_v4 = vld [vmem:[%s2785_s0 + $0xb0] sm:$0xff]  ;;  %v37_v6 = vld [vmem:[%s2785_s0 + $0xb8] sm:$0xff]  ;;  %v38_v8 = vld [vmem:[%s2785_s0 + $0xc0] sm:$0xff] }
  0x16   :  { %1688 = vmatprep.subr.bf16.mxu0 %v1687_v19  ;;  %1704 = vmatprep.subr.bf16.mxu1 %v1687_v19  ;;  %v108_v5 = vld [vmem:[%s2785_s0 + $0x2f0] sm:$0xff]  ;;  %v109_v7 = vld [vmem:[%s2785_s0 + $0x2f8] sm:$0xff]  ;;  %v110_v9 = vld [vmem:[%s2785_s0 + $0x300] sm:$0xff] }
  0x17   :  { %v39_v10 = vld [vmem:[%s2785_s0 + $0xc8] sm:$0xff]  ;;  %v40_v12 = vld [vmem:[%s2785_s0 + $0xd0] sm:$0xff]  ;;  %v41_v14 = vld [vmem:[%s2785_s0 + $0xd8] sm:$0xff] }
  0x18   :  { %v111_v11 = vld [vmem:[%s2785_s0 + $0x308] sm:$0xff]  ;;  %v112_v13 = vld [vmem:[%s2785_s0 + $0x310] sm:$0xff]  ;;  %v113_v15 = vld [vmem:[%s2785_s0 + $0x318] sm:$0xff] }
  0x19   :  { %1690 = vmatpush3.bf16.msra.mxu0 %v1687_v19  ;;  %1712 = vmatpush3.bf16.msra.mxu1 %v1687_v19  ;;  %v42_v16 = vld [vmem:[%s2785_s0 + $0xe0] sm:$0xff]  ;;  %v43_v18 = vld [vmem:[%s2785_s0 + $0xe8] sm:$0xff]  ;;  %v44_v20 = vld [vmem:[%s2785_s0 + $0xf0] sm:$0xff] }
  0x1a   :  { %1692 = vmatprep.subr.bf16.mxu0 %v1691_v22  ;;  %1705 = vmatprep.subr.bf16.mxu1 %v1691_v22  ;;  %v114_v17 = vld [vmem:[%s2785_s0 + $0x320] sm:$0xff]  ;;  %v115_v19 = vld [vmem:[%s2785_s0 + $0x328] sm:$0xff]  ;;  %v116_v21 = vld [vmem:[%s2785_s0 + $0x330] sm:$0xff] }
  0x1b   :  { %v117_v23 = vld [vmem:[%s2785_s0 + $0x338] sm:$0xff]  ;;  %v46_v24 = vld [vmem:[%s2785_s0 + $0x100] sm:$0xff] }
  0x1d   :  { %1694 = vmatpush3.bf16.msra.mxu0 %v1691_v22  ;;  %1713 = vmatpush3.bf16.msra.mxu1 %v1691_v22  ;;  %v45_v22 = vld [vmem:[%s2785_s0 + $0xf8] sm:$0xff] }
  0x1e   :  { %1696 = vmatprep.subr.bf16.mxu0 %v1695_v25  ;;  %1706 = vmatprep.subr.bf16.mxu1 %v1695_v25 }
  0x21   :  { %1698 = vmatpush3.bf16.msra.mxu0 %v1695_v25  ;;  %1714 = vmatpush3.bf16.msra.mxu1 %v1695_v25  ;;  %v118_v25 = vld [vmem:[%s2785_s0 + $0x340] sm:$0xff] }
  0x24   :  { %1452 = vmatmul.mubr.f32.vlgmr.msra.gmra.mrb[0].mxu0 %v15_v26  ;;  %1560 = vmatmul.mubr.f32.vlgmr.msra.gmra.mrb[0].mxu1 %v87_v27  ;;  %v47_v26 = vld [vmem:[%s2785_s0 + $0x108] sm:$0xff] }
  0x25   :  { %1454 = vmatprep.mubr.f32.mxu0 %v16_v28  ;;  %1562 = vmatprep.mubr.f32.mxu1 %v88_v29  ;;  %v119_v27 = vld [vmem:[%s2785_s0 + $0x348] sm:$0xff]  ;;  %v48_v28 = vld [vmem:[%s2785_s0 + $0x110] sm:$0xff] }
  0x26   :  { %v120_v29 = vld [vmem:[%s2785_s0 + $0x350] sm:$0xff] }
  0x28   :  { %1455 = vmatmul.mubr.f32.gmra.mrb[2].mxu0 %v17_v30  ;;  %1563 = vmatmul.mubr.f32.gmra.mrb[2].mxu1 %v89_v31  ;;  %v49_v30 = vld [vmem:[%s2785_s0 + $0x118] sm:$0xff] }
  0x29   :  { %1457 = vmatprep.mubr.f32.mxu0 %v18_v32  ;;  %1565 = vmatprep.mubr.f32.mxu1 %v90_v33  ;;  %v121_v31 = vld [vmem:[%s2785_s0 + $0x358] sm:$0xff]  ;;  %v50_v32 = vld [vmem:[%s2785_s0 + $0x120] sm:$0xff] }
  0x2a   :  { %v122_v33 = vld [vmem:[%s2785_s0 + $0x360] sm:$0xff] }
  0x2c   :  { %1458 = vmatmul.mubr.f32.gmra.mrb[4].mxu0 %v19_v34  ;;  %1566 = vmatmul.mubr.f32.gmra.mrb[4].mxu1 %v91_v35  ;;  %v51_v34 = vld [vmem:[%s2785_s0 + $0x128] sm:$0xff] }
  0x2d   :  { %1460 = vmatprep.mubr.f32.mxu0 %v20_v36  ;;  %1568 = vmatprep.mubr.f32.mxu1 %v92_v37  ;;  %v123_v35 = vld [vmem:[%s2785_s0 + $0x368] sm:$0xff]  ;;  %v52_v36 = vld [vmem:[%s2785_s0 + $0x130] sm:$0xff] }
  0x2e   :  { %v124_v37 = vld [vmem:[%s2785_s0 + $0x370] sm:$0xff] }
  0x30   :  { %1461 = vmatmul.mubr.f32.gmra.mrb[6].mxu0 %v21_v38  ;;  %1569 = vmatmul.mubr.f32.gmra.mrb[6].mxu1 %v93_v39  ;;  %v53_v38 = vld [vmem:[%s2785_s0 + $0x138] sm:$0xff] }
  0x31   :  { %1463 = vmatprep.mubr.f32.mxu0 %v22_v40  ;;  %1571 = vmatprep.mubr.f32.mxu1 %v94_v41  ;;  %v125_v39 = vld [vmem:[%s2785_s0 + $0x378] sm:$0xff]  ;;  %v54_v40 = vld [vmem:[%s2785_s0 + $0x140] sm:$0xff] }
  0x32   :  { %v126_v41 = vld [vmem:[%s2785_s0 + $0x380] sm:$0xff] }
  0x34   :  { %1464 = vmatmul.mubr.f32.gmra.mrb[8].mxu0 %v23_v42  ;;  %1572 = vmatmul.mubr.f32.gmra.mrb[8].mxu1 %v95_v43  ;;  %v55_v42 = vld [vmem:[%s2785_s0 + $0x148] sm:$0xff] }
  0x35   :  { %1466 = vmatprep.mubr.f32.mxu0 %v24_v44  ;;  %1574 = vmatprep.mubr.f32.mxu1 %v96_v45  ;;  %v127_v43 = vld [vmem:[%s2785_s0 + $0x388] sm:$0xff]  ;;  %v56_v44 = vld [vmem:[%s2785_s0 + $0x150] sm:$0xff] }
  0x36   :  { %v128_v45 = vld [vmem:[%s2785_s0 + $0x390] sm:$0xff] }
  0x38   :  { %1467 = vmatmul.mubr.f32.gmra.mrb[10].mxu0 %v25_v46  ;;  %1575 = vmatmul.mubr.f32.gmra.mrb[10].mxu1 %v97_v47  ;;  %v57_v46 = vld [vmem:[%s2785_s0 + $0x158] sm:$0xff] }
  0x39   :  { %1469 = vmatprep.mubr.f32.mxu0 %v26_v48  ;;  %1577 = vmatprep.mubr.f32.mxu1 %v98_v49  ;;  %v129_v47 = vld [vmem:[%s2785_s0 + $0x398] sm:$0xff]  ;;  %v58_v48 = vld [vmem:[%s2785_s0 + $0x160] sm:$0xff] }
  0x3a   :  { %v130_v49 = vld [vmem:[%s2785_s0 + $0x3a0] sm:$0xff] }
  0x3c   :  { %1470 = vmatmul.mubr.f32.gmra.mrb[12].mxu0 %v27_v50  ;;  %1578 = vmatmul.mubr.f32.gmra.mrb[12].mxu1 %v99_v51  ;;  %v59_v50 = vld [vmem:[%s2785_s0 + $0x168] sm:$0xff] }
  0x3d   :  { %1472 = vmatprep.mubr.f32.mxu0 %v28_v52  ;;  %1580 = vmatprep.mubr.f32.mxu1 %v100_v53  ;;  %v131_v51 = vld [vmem:[%s2785_s0 + $0x3a8] sm:$0xff]  ;;  %v60_v52 = vld [vmem:[%s2785_s0 + $0x170] sm:$0xff] }
  0x3e   :  { %v132_v53 = vld [vmem:[%s2785_s0 + $0x3b0] sm:$0xff] }
  0x40   :  { %1473 = vmatmul.mubr.f32.gmra.mrb[14].mxu0 %v29_v54  ;;  %1581 = vmatmul.mubr.f32.gmra.mrb[14].mxu1 %v101_v55  ;;  %v61_v54 = vld [vmem:[%s2785_s0 + $0x178] sm:$0xff] }
  0x41   :  { %1475 = vmatprep.mubr.f32.mxu0 %v30_v56  ;;  %1583 = vmatprep.mubr.f32.mxu1 %v102_v57  ;;  %v133_v55 = vld [vmem:[%s2785_s0 + $0x3b8] sm:$0xff]  ;;  %v62_v56 = vld [vmem:[%s2785_s0 + $0x180] sm:$0xff] }
  0x42   :  { %v134_v57 = vld [vmem:[%s2785_s0 + $0x3c0] sm:$0xff] }
  0x44   :  { %1476 = vmatmul.mubr.f32.gmra.mrb[16].mxu0 %v31_v58  ;;  %1584 = vmatmul.mubr.f32.gmra.mrb[16].mxu1 %v103_v59  ;;  %v63_v58 = vld [vmem:[%s2785_s0 + $0x188] sm:$0xff] }
  0x45   :  { %1478 = vmatprep.mubr.f32.mxu0 %v32_v60  ;;  %1586 = vmatprep.mubr.f32.mxu1 %v104_v61  ;;  %v135_v59 = vld [vmem:[%s2785_s0 + $0x3c8] sm:$0xff]  ;;  %v64_v60 = vld [vmem:[%s2785_s0 + $0x190] sm:$0xff] }
  0x46   :  { %v136_v61 = vld [vmem:[%s2785_s0 + $0x3d0] sm:$0xff] }
  0x48   :  { %1479 = vmatmul.mubr.f32.gmra.mrb[18].mxu0 %v33_v62  ;;  %1587 = vmatmul.mubr.f32.gmra.mrb[18].mxu1 %v105_v63  ;;  %v65_v62 = vld [vmem:[%s2785_s0 + $0x198] sm:$0xff] }
  0x49   :  { %1481 = vmatprep.mubr.f32.mxu0 %v34_v0  ;;  %1589 = vmatprep.mubr.f32.mxu1 %v106_v1  ;;  %v137_v63 = vld [vmem:[%s2785_s0 + $0x3d8] sm:$0xff]  ;;  %v66_v0 = vld [vmem:[%s2785_s0 + $0x1a0] sm:$0xff] }
  0x4a   :  { %v138_v1 = vld [vmem:[%s2785_s0 + $0x3e0] sm:$0xff] }
  0x4c   :  { %1482 = vmatmul.mubr.f32.gmra.mrb[20].mxu0 %v35_v2  ;;  %1590 = vmatmul.mubr.f32.gmra.mrb[20].mxu1 %v107_v3  ;;  %v67_v2 = vld [vmem:[%s2785_s0 + $0x1a8] sm:$0xff] }
  0x4d   :  { %1484 = vmatprep.mubr.f32.mxu0 %v36_v4  ;;  %1592 = vmatprep.mubr.f32.mxu1 %v108_v5  ;;  %v139_v3 = vld [vmem:[%s2785_s0 + $0x3e8] sm:$0xff]  ;;  %v68_v4 = vld [vmem:[%s2785_s0 + $0x1b0] sm:$0xff] }
  0x4e   :  { %v140_v5 = vld [vmem:[%s2785_s0 + $0x3f0] sm:$0xff] }
  0x50   :  { %1485 = vmatmul.mubr.f32.gmra.mrb[22].mxu0 %v37_v6  ;;  %1593 = vmatmul.mubr.f32.gmra.mrb[22].mxu1 %v109_v7  ;;  %v69_v6 = vld [vmem:[%s2785_s0 + $0x1b8] sm:$0xff] }
  0x51   :  { %1487 = vmatprep.mubr.f32.mxu0 %v38_v8  ;;  %1595 = vmatprep.mubr.f32.mxu1 %v110_v9  ;;  %v141_v7 = vld [vmem:[%s2785_s0 + $0x3f8] sm:$0xff]  ;;  %v70_v8 = vld [vmem:[%s2785_s0 + $0x1c0] sm:$0xff] }
  0x52   :  { %v142_v9 = vld [vmem:[%s2785_s0 + $0x400] sm:$0xff] }
  0x54   :  { %1488 = vmatmul.mubr.f32.gmra.mrb[24].mxu0 %v39_v10  ;;  %1596 = vmatmul.mubr.f32.gmra.mrb[24].mxu1 %v111_v11  ;;  %v71_v10 = vld [vmem:[%s2785_s0 + $0x1c8] sm:$0xff] }
  0x55   :  { %1490 = vmatprep.mubr.f32.mxu0 %v40_v12  ;;  %1598 = vmatprep.mubr.f32.mxu1 %v112_v13  ;;  %v143_v11 = vld [vmem:[%s2785_s0 + $0x408] sm:$0xff]  ;;  %v72_v12 = vld [vmem:[%s2785_s0 + $0x1d0] sm:$0xff] }
  0x56   :  { %v144_v13 = vld [vmem:[%s2785_s0 + $0x410] sm:$0xff] }
  0x58   :  { %1491 = vmatmul.mubr.f32.gmra.mrb[26].mxu0 %v41_v14  ;;  %1599 = vmatmul.mubr.f32.gmra.mrb[26].mxu1 %v113_v15  ;;  %v73_v14 = vld [vmem:[%s2785_s0 + $0x1d8] sm:$0xff] }
  0x59   :  { %1493 = vmatprep.mubr.f32.mxu0 %v42_v16  ;;  %1601 = vmatprep.mubr.f32.mxu1 %v114_v17  ;;  %v145_v15 = vld [vmem:[%s2785_s0 + $0x418] sm:$0xff]  ;;  %v74_v16 = vld [vmem:[%s2785_s0 + $0x1e0] sm:$0xff] }
  0x5a   :  { %v146_v17 = vld [vmem:[%s2785_s0 + $0x420] sm:$0xff] }
  0x5c   :  { %1494 = vmatmul.mubr.f32.gmra.mrb[28].mxu0 %v43_v18  ;;  %1602 = vmatmul.mubr.f32.gmra.mrb[28].mxu1 %v115_v19  ;;  %v75_v18 = vld [vmem:[%s2785_s0 + $0x1e8] sm:$0xff] }
  0x5d   :  { %1496 = vmatprep.mubr.f32.mxu0 %v44_v20  ;;  %1604 = vmatprep.mubr.f32.mxu1 %v116_v21  ;;  %v147_v19 = vld [vmem:[%s2785_s0 + $0x428] sm:$0xff]  ;;  %v76_v20 = vld [vmem:[%s2785_s0 + $0x1f0] sm:$0xff] }
  0x5e   :  { %v148_v21 = vld [vmem:[%s2785_s0 + $0x430] sm:$0xff] }
  0x60   :  { %1497 = vmatmul.mubr.f32.gmra.mrb[30].mxu0 %v45_v22  ;;  %1605 = vmatmul.mubr.f32.gmra.mrb[30].mxu1 %v117_v23  ;;  %v77_v22 = vld [vmem:[%s2785_s0 + $0x1f8] sm:$0xff] }
  0x61   :  { %1499 = vmatprep.mubr.f32.mxu0 %v46_v24  ;;  %1607 = vmatprep.mubr.f32.mxu1 %v118_v25  ;;  %v149_v23 = vld [vmem:[%s2785_s0 + $0x438] sm:$0xff]  ;;  %v78_v24 = vld [vmem:[%s2785_s0 + $0x200] sm:$0xff] }
  0x62   :  { %v150_v25 = vld [vmem:[%s2785_s0 + $0x440] sm:$0xff] }
  0x64   :  { %1500 = vmatmul.mubr.f32.gmra.mrb[32].mxu0 %v47_v26  ;;  %1608 = vmatmul.mubr.f32.gmra.mrb[32].mxu1 %v119_v27  ;;  %v79_v26 = vld [vmem:[%s2785_s0 + $0x208] sm:$0xff] }
  0x65   :  { %1502 = vmatprep.mubr.f32.mxu0 %v48_v28  ;;  %1610 = vmatprep.mubr.f32.mxu1 %v120_v29  ;;  %v151_v27 = vld [vmem:[%s2785_s0 + $0x448] sm:$0xff]  ;;  %v80_v28 = vld [vmem:[%s2785_s0 + $0x210] sm:$0xff] }
  0x66   :  { %v152_v29 = vld [vmem:[%s2785_s0 + $0x450] sm:$0xff] }
  0x68   :  { %1503 = vmatmul.mubr.f32.gmra.mrb[34].mxu0 %v49_v30  ;;  %1611 = vmatmul.mubr.f32.gmra.mrb[34].mxu1 %v121_v31  ;;  %v81_v30 = vld [vmem:[%s2785_s0 + $0x218] sm:$0xff] }
  0x69   :  { %1505 = vmatprep.mubr.f32.mxu0 %v50_v32  ;;  %1613 = vmatprep.mubr.f32.mxu1 %v122_v33  ;;  %v153_v31 = vld [vmem:[%s2785_s0 + $0x458] sm:$0xff]  ;;  %v82_v32 = vld [vmem:[%s2785_s0 + $0x220] sm:$0xff] }
  0x6a   :  { %v154_v33 = vld [vmem:[%s2785_s0 + $0x460] sm:$0xff] }
  0x6c   :  { %1506 = vmatmul.mubr.f32.gmra.mrb[36].mxu0 %v51_v34  ;;  %1614 = vmatmul.mubr.f32.gmra.mrb[36].mxu1 %v123_v35  ;;  %v83_v34 = vld [vmem:[%s2785_s0 + $0x228] sm:$0xff] }
  0x6d   :  { %1508 = vmatprep.mubr.f32.mxu0 %v52_v36  ;;  %1616 = vmatprep.mubr.f32.mxu1 %v124_v37  ;;  %v155_v35 = vld [vmem:[%s2785_s0 + $0x468] sm:$0xff]  ;;  %v84_v36 = vld [vmem:[%s2785_s0 + $0x230] sm:$0xff] }
  0x6e   :  { %v156_v37 = vld [vmem:[%s2785_s0 + $0x470] sm:$0xff] }
  0x70   :  { %1509 = vmatmul.mubr.f32.gmra.mrb[38].mxu0 %v53_v38  ;;  %1617 = vmatmul.mubr.f32.gmra.mrb[38].mxu1 %v125_v39  ;;  %v85_v38 = vld [vmem:[%s2785_s0 + $0x238] sm:$0xff] }
  0x71   :  { %1511 = vmatprep.mubr.f32.mxu0 %v54_v40  ;;  %1619 = vmatprep.mubr.f32.mxu1 %v126_v41  ;;  %v157_v39 = vld [vmem:[%s2785_s0 + $0x478] sm:$0xff]  ;;  %v2219_v40 = vld [vmem:[%s2786_s2] ss:$0 sm:$0xff] }
  0x74   :  { %1512 = vmatmul.mubr.f32.gmra.mrb[40].mxu0 %v55_v42  ;;  %1620 = vmatmul.mubr.f32.gmra.mrb[40].mxu1 %v127_v43 }
  0x75   :  { %1514 = vmatprep.mubr.f32.mxu0 %v56_v44  ;;  %1622 = vmatprep.mubr.f32.mxu1 %v128_v45 }
  0x78   :  { %1515 = vmatmul.mubr.f32.gmra.mrb[42].mxu0 %v57_v46  ;;  %1623 = vmatmul.mubr.f32.gmra.mrb[42].mxu1 %v129_v47 }
  0x79   :  { %1517 = vmatprep.mubr.f32.mxu0 %v58_v48  ;;  %1625 = vmatprep.mubr.f32.mxu1 %v130_v49 }
  0x7c   :  { %1518 = vmatmul.mubr.f32.gmra.mrb[44].mxu0 %v59_v50  ;;  %1626 = vmatmul.mubr.f32.gmra.mrb[44].mxu1 %v131_v51 }
  0x7d   :  { %1520 = vmatprep.mubr.f32.mxu0 %v60_v52  ;;  %1628 = vmatprep.mubr.f32.mxu1 %v132_v53 }
  0x80   :  { %1521 = vmatmul.mubr.f32.gmra.mrb[46].mxu0 %v61_v54  ;;  %1629 = vmatmul.mubr.f32.gmra.mrb[46].mxu1 %v133_v55 }
  0x81   :  { %1523 = vmatprep.mubr.f32.mxu0 %v62_v56  ;;  %1631 = vmatprep.mubr.f32.mxu1 %v134_v57 }
  0x84   :  { %1524 = vmatmul.mubr.f32.gmra.mrb[48].mxu0 %v63_v58  ;;  %1632 = vmatmul.mubr.f32.gmra.mrb[48].mxu1 %v135_v59 }
  0x85   :  { %1526 = vmatprep.mubr.f32.mxu0 %v64_v60  ;;  %1634 = vmatprep.mubr.f32.mxu1 %v136_v61 }
  0x88   :  { %1527 = vmatmul.mubr.f32.gmra.mrb[50].mxu0 %v65_v62  ;;  %1635 = vmatmul.mubr.f32.gmra.mrb[50].mxu1 %v137_v63 }
  0x89   :  { %1529 = vmatprep.mubr.f32.mxu0 %v66_v0  ;;  %1637 = vmatprep.mubr.f32.mxu1 %v138_v1 }
  0x8c   :  { %1530 = vmatmul.mubr.f32.gmra.mrb[52].mxu0 %v67_v2  ;;  %1638 = vmatmul.mubr.f32.gmra.mrb[52].mxu1 %v139_v3 }
  0x8d   :  { %1532 = vmatprep.mubr.f32.mxu0 %v68_v4  ;;  %1640 = vmatprep.mubr.f32.mxu1 %v140_v5 }
  0x90   :  { %1533 = vmatmul.mubr.f32.gmra.mrb[54].mxu0 %v69_v6  ;;  %1641 = vmatmul.mubr.f32.gmra.mrb[54].mxu1 %v141_v7 }
  0x91   :  { %1535 = vmatprep.mubr.f32.mxu0 %v70_v8  ;;  %1643 = vmatprep.mubr.f32.mxu1 %v142_v9 }
  0x94   :  { %1536 = vmatmul.mubr.f32.gmra.mrb[56].mxu0 %v71_v10  ;;  %1644 = vmatmul.mubr.f32.gmra.mrb[56].mxu1 %v143_v11 }
  0x95   :  { %1538 = vmatprep.mubr.f32.mxu0 %v72_v12  ;;  %1646 = vmatprep.mubr.f32.mxu1 %v144_v13 }
  0x98   :  { %1539 = vmatmul.mubr.f32.gmra.mrb[58].mxu0 %v73_v14  ;;  %1647 = vmatmul.mubr.f32.gmra.mrb[58].mxu1 %v145_v15 }
  0x99   :  { %1541 = vmatprep.mubr.f32.mxu0 %v74_v16  ;;  %1649 = vmatprep.mubr.f32.mxu1 %v146_v17 }
  0x9c   :  { %1542 = vmatmul.mubr.f32.gmra.mrb[60].mxu0 %v75_v18  ;;  %1650 = vmatmul.mubr.f32.gmra.mrb[60].mxu1 %v147_v19 }
  0x9d   :  { %1544 = vmatprep.mubr.f32.mxu0 %v76_v20  ;;  %1652 = vmatprep.mubr.f32.mxu1 %v148_v21 }
  0xa0   :  { %1545 = vmatmul.mubr.f32.gmra.mrb[62].mxu0 %v77_v22  ;;  %1653 = vmatmul.mubr.f32.gmra.mrb[62].mxu1 %v149_v23 }
  0xa1   :  { %1547 = vmatprep.mubr.f32.mxu0 %v78_v24  ;;  %1655 = vmatprep.mubr.f32.mxu1 %v150_v25 }
  0xa4   :  { %1548 = vmatmul.mubr.f32.gmra.mrb[64].mxu0 %v79_v26  ;;  %1656 = vmatmul.mubr.f32.gmra.mrb[64].mxu1 %v151_v27 }
  0xa5   :  { %1550 = vmatprep.mubr.f32.mxu0 %v80_v28  ;;  %1658 = vmatprep.mubr.f32.mxu1 %v152_v29 }
  0xa8   :  { %1551 = vmatmul.mubr.f32.gmra.mrb[66].mxu0 %v81_v30  ;;  %1659 = vmatmul.mubr.f32.gmra.mrb[66].mxu1 %v153_v31 }
  0xa9   :  { %1553 = vmatprep.mubr.f32.mxu0 %v82_v32  ;;  %1661 = vmatprep.mubr.f32.mxu1 %v154_v33 }
  0xac   :  { %1554 = vmatmul.mubr.f32.gmra.mrb[68].mxu0 %v83_v34  ;;  %1662 = vmatmul.mubr.f32.gmra.mrb[68].mxu1 %v155_v35 }
  0xad   :  { %1556 = vmatprep.mubr.f32.mxu0 %v84_v36  ;;  %1664 = vmatprep.mubr.f32.mxu1 %v156_v37 }
  0xb0   :  { %1557 = vmatmul.mubr.f32.gmra.mrb[70].mxu0 %v85_v38  ;;  %1665 = vmatmul.mubr.f32.gmra.mrb[70].mxu1 %v157_v39 }
  0xf7   :  { %v1453_v41 = vpop.f32.mrb[0].mxu0  ;;  %v1561_v42 = vpop.f32.mrb[0].mxu1 }
  0xf8   :  { %v253_v43 = vadd.f32 %v1453_v41, %v2219_v40  ;;  %v613_v44 = vadd.f32 %v1561_v42, %v2219_v40  ;;  %v247_v45 = vpop.f32.mrb[1].mxu0  ;;  %v607_v46 = vpop.f32.mrb[1].mxu1 }
  0xf9   :  { %v248_v47 = vadd.f32 %v2219_v40, %v247_v45  ;;  %v608_v48 = vadd.f32 %v2219_v40, %v607_v46 }
  0xfa   :  { %v967_v49 = vmax.f32 %v253_v43, 0.0  ;;  %v1039_v50 = vmax.f32 %v613_v44, 0.0 }
  0xfb   :  { %v966_v51 = vmax.f32 %v248_v47, 0.0  ;;  %v1038_v52 = vmax.f32 %v608_v48, 0.0  ;;  %v1456_v53 = vpop.f32.mrb[2].mxu0  ;;  %v1564_v54 = vpop.f32.mrb[2].mxu1 }
  0xfc   :  { %1111 = vst [vmem:[%s2787_s3 + $0x8] sm:$0xff] %v967_v49  ;;  %1183 = vst [vmem:[%s2787_s3 + $0x248] sm:$0xff] %v1039_v50  ;;  %v263_v55 = vadd.f32 %v1456_v53, %v2219_v40  ;;  %v623_v56 = vadd.f32 %v1564_v54, %v2219_v40  ;;  %v257_v57 = vpop.f32.mrb[3].mxu0  ;;  %v617_v58 = vpop.f32.mrb[3].mxu1 }
  0xfd   :  { %1110 = vst [vmem:[%s2787_s3] sm:$0xff] %v966_v51  ;;  %1182 = vst [vmem:[%s2787_s3 + $0x240] sm:$0xff] %v1038_v52  ;;  %v258_v59 = vadd.f32 %v2219_v40, %v257_v57  ;;  %v618_v60 = vadd.f32 %v2219_v40, %v617_v58 }
  0xfe   :  { %v969_v61 = vmax.f32 %v263_v55, 0.0  ;;  %v1041_v62 = vmax.f32 %v623_v56, 0.0 }
  0xff   :  { %v968_v63 = vmax.f32 %v258_v59, 0.0  ;;  %v1040_v0 = vmax.f32 %v618_v60, 0.0  ;;  %v1459_v1 = vpop.f32.mrb[4].mxu0  ;;  %v1567_v2 = vpop.f32.mrb[4].mxu1 }
 0x100   :  { %1113 = vst [vmem:[%s2787_s3 + $0x18] sm:$0xff] %v969_v61  ;;  %1185 = vst [vmem:[%s2787_s3 + $0x258] sm:$0xff] %v1041_v62  ;;  %v273_v3 = vadd.f32 %v1459_v1, %v2219_v40  ;;  %v633_v4 = vadd.f32 %v1567_v2, %v2219_v40  ;;  %v267_v5 = vpop.f32.mrb[5].mxu0  ;;  %v627_v6 = vpop.f32.mrb[5].mxu1 }
 0x101   :  { %1112 = vst [vmem:[%s2787_s3 + $0x10] sm:$0xff] %v968_v63  ;;  %1184 = vst [vmem:[%s2787_s3 + $0x250] sm:$0xff] %v1040_v0  ;;  %v268_v7 = vadd.f32 %v2219_v40, %v267_v5  ;;  %v628_v8 = vadd.f32 %v2219_v40, %v627_v6 }
 0x102   :  { %v971_v9 = vmax.f32 %v273_v3, 0.0  ;;  %v1043_v10 = vmax.f32 %v633_v4, 0.0 }
 0x103   :  { %v970_v11 = vmax.f32 %v268_v7, 0.0  ;;  %v1042_v12 = vmax.f32 %v628_v8, 0.0  ;;  %v1462_v13 = vpop.f32.mrb[6].mxu0  ;;  %v1570_v14 = vpop.f32.mrb[6].mxu1 }
 0x104   :  { %1115 = vst [vmem:[%s2787_s3 + $0x28] sm:$0xff] %v971_v9  ;;  %1187 = vst [vmem:[%s2787_s3 + $0x268] sm:$0xff] %v1043_v10  ;;  %v283_v15 = vadd.f32 %v1462_v13, %v2219_v40  ;;  %v643_v16 = vadd.f32 %v1570_v14, %v2219_v40  ;;  %v277_v17 = vpop.f32.mrb[7].mxu0  ;;  %v637_v18 = vpop.f32.mrb[7].mxu1 }
 0x105   :  { %1114 = vst [vmem:[%s2787_s3 + $0x20] sm:$0xff] %v970_v11  ;;  %1186 = vst [vmem:[%s2787_s3 + $0x260] sm:$0xff] %v1042_v12  ;;  %v278_v19 = vadd.f32 %v2219_v40, %v277_v17  ;;  %v638_v20 = vadd.f32 %v2219_v40, %v637_v18 }
 0x106   :  { %v973_v21 = vmax.f32 %v283_v15, 0.0  ;;  %v1045_v22 = vmax.f32 %v643_v16, 0.0 }
 0x107   :  { %v972_v23 = vmax.f32 %v278_v19, 0.0  ;;  %v1044_v24 = vmax.f32 %v638_v20, 0.0  ;;  %v1465_v25 = vpop.f32.mrb[8].mxu0  ;;  %v1573_v26 = vpop.f32.mrb[8].mxu1 }
 0x108   :  { %1117 = vst [vmem:[%s2787_s3 + $0x38] sm:$0xff] %v973_v21  ;;  %1189 = vst [vmem:[%s2787_s3 + $0x278] sm:$0xff] %v1045_v22  ;;  %v293_v27 = vadd.f32 %v1465_v25, %v2219_v40  ;;  %v653_v28 = vadd.f32 %v1573_v26, %v2219_v40  ;;  %v287_v29 = vpop.f32.mrb[9].mxu0  ;;  %v647_v30 = vpop.f32.mrb[9].mxu1 }
 0x109   :  { %1116 = vst [vmem:[%s2787_s3 + $0x30] sm:$0xff] %v972_v23  ;;  %1188 = vst [vmem:[%s2787_s3 + $0x270] sm:$0xff] %v1044_v24  ;;  %v288_v31 = vadd.f32 %v2219_v40, %v287_v29  ;;  %v648_v32 = vadd.f32 %v2219_v40, %v647_v30 }
 0x10a   :  { %v975_v33 = vmax.f32 %v293_v27, 0.0  ;;  %v1047_v34 = vmax.f32 %v653_v28, 0.0 }
 0x10b   :  { %v974_v35 = vmax.f32 %v288_v31, 0.0  ;;  %v1046_v36 = vmax.f32 %v648_v32, 0.0  ;;  %v1468_v37 = vpop.f32.mrb[10].mxu0  ;;  %v1576_v38 = vpop.f32.mrb[10].mxu1 }
 0x10c   :  { %1119 = vst [vmem:[%s2787_s3 + $0x48] sm:$0xff] %v975_v33  ;;  %1191 = vst [vmem:[%s2787_s3 + $0x288] sm:$0xff] %v1047_v34  ;;  %v303_v39 = vadd.f32 %v1468_v37, %v2219_v40  ;;  %v663_v41 = vadd.f32 %v1576_v38, %v2219_v40  ;;  %v297_v42 = vpop.f32.mrb[11].mxu0  ;;  %v657_v43 = vpop.f32.mrb[11].mxu1 }
 0x10d   :  { %1118 = vst [vmem:[%s2787_s3 + $0x40] sm:$0xff] %v974_v35  ;;  %1190 = vst [vmem:[%s2787_s3 + $0x280] sm:$0xff] %v1046_v36  ;;  %v298_v44 = vadd.f32 %v2219_v40, %v297_v42  ;;  %v658_v45 = vadd.f32 %v2219_v40, %v657_v43 }
 0x10e   :  { %v977_v46 = vmax.f32 %v303_v39, 0.0  ;;  %v1049_v47 = vmax.f32 %v663_v41, 0.0 }
 0x10f   :  { %v976_v48 = vmax.f32 %v298_v44, 0.0  ;;  %v1048_v49 = vmax.f32 %v658_v45, 0.0  ;;  %v1471_v50 = vpop.f32.mrb[12].mxu0  ;;  %v1579_v51 = vpop.f32.mrb[12].mxu1 }
 0x110   :  { %1121 = vst [vmem:[%s2787_s3 + $0x58] sm:$0xff] %v977_v46  ;;  %1193 = vst [vmem:[%s2787_s3 + $0x298] sm:$0xff] %v1049_v47  ;;  %v313_v52 = vadd.f32 %v1471_v50, %v2219_v40  ;;  %v673_v53 = vadd.f32 %v1579_v51, %v2219_v40  ;;  %v307_v54 = vpop.f32.mrb[13].mxu0  ;;  %v667_v55 = vpop.f32.mrb[13].mxu1 }
 0x111   :  { %1120 = vst [vmem:[%s2787_s3 + $0x50] sm:$0xff] %v976_v48  ;;  %1192 = vst [vmem:[%s2787_s3 + $0x290] sm:$0xff] %v1048_v49  ;;  %v308_v56 = vadd.f32 %v2219_v40, %v307_v54  ;;  %v668_v57 = vadd.f32 %v2219_v40, %v667_v55 }
 0x112   :  { %v979_v58 = vmax.f32 %v313_v52, 0.0  ;;  %v1051_v59 = vmax.f32 %v673_v53, 0.0 }
 0x113   :  { %v978_v60 = vmax.f32 %v308_v56, 0.0  ;;  %v1050_v61 = vmax.f32 %v668_v57, 0.0  ;;  %v1474_v62 = vpop.f32.mrb[14].mxu0  ;;  %v1582_v63 = vpop.f32.mrb[14].mxu1 }
 0x114   :  { %1123 = vst [vmem:[%s2787_s3 + $0x68] sm:$0xff] %v979_v58  ;;  %1195 = vst [vmem:[%s2787_s3 + $0x2a8] sm:$0xff] %v1051_v59  ;;  %v323_v0 = vadd.f32 %v1474_v62, %v2219_v40  ;;  %v683_v1 = vadd.f32 %v1582_v63, %v2219_v40  ;;  %v317_v2 = vpop.f32.mrb[15].mxu0  ;;  %v677_v3 = vpop.f32.mrb[15].mxu1 }
 0x115   :  { %1122 = vst [vmem:[%s2787_s3 + $0x60] sm:$0xff] %v978_v60  ;;  %1194 = vst [vmem:[%s2787_s3 + $0x2a0] sm:$0xff] %v1050_v61  ;;  %v318_v4 = vadd.f32 %v2219_v40, %v317_v2  ;;  %v678_v5 = vadd.f32 %v2219_v40, %v677_v3 }
 0x116   :  { %v981_v6 = vmax.f32 %v323_v0, 0.0  ;;  %v1053_v7 = vmax.f32 %v683_v1, 0.0 }
 0x117   :  { %v980_v8 = vmax.f32 %v318_v4, 0.0  ;;  %v1052_v9 = vmax.f32 %v678_v5, 0.0  ;;  %v1477_v10 = vpop.f32.mrb[16].mxu0  ;;  %v1585_v11 = vpop.f32.mrb[16].mxu1 }
 0x118   :  { %1125 = vst [vmem:[%s2787_s3 + $0x78] sm:$0xff] %v981_v6  ;;  %1197 = vst [vmem:[%s2787_s3 + $0x2b8] sm:$0xff] %v1053_v7  ;;  %v333_v12 = vadd.f32 %v1477_v10, %v2219_v40  ;;  %v693_v13 = vadd.f32 %v1585_v11, %v2219_v40  ;;  %v327_v14 = vpop.f32.mrb[17].mxu0  ;;  %v687_v15 = vpop.f32.mrb[17].mxu1 }
 0x119   :  { %1124 = vst [vmem:[%s2787_s3 + $0x70] sm:$0xff] %v980_v8  ;;  %1196 = vst [vmem:[%s2787_s3 + $0x2b0] sm:$0xff] %v1052_v9  ;;  %v328_v16 = vadd.f32 %v2219_v40, %v327_v14  ;;  %v688_v17 = vadd.f32 %v2219_v40, %v687_v15 }
 0x11a   :  { %v983_v18 = vmax.f32 %v333_v12, 0.0  ;;  %v1055_v19 = vmax.f32 %v693_v13, 0.0 }
 0x11b   :  { %v982_v20 = vmax.f32 %v328_v16, 0.0  ;;  %v1054_v21 = vmax.f32 %v688_v17, 0.0  ;;  %v1480_v22 = vpop.f32.mrb[18].mxu0  ;;  %v1588_v23 = vpop.f32.mrb[18].mxu1 }
 0x11c   :  { %1127 = vst [vmem:[%s2787_s3 + $0x88] sm:$0xff] %v983_v18  ;;  %1199 = vst [vmem:[%s2787_s3 + $0x2c8] sm:$0xff] %v1055_v19  ;;  %v343_v24 = vadd.f32 %v1480_v22, %v2219_v40  ;;  %v703_v25 = vadd.f32 %v1588_v23, %v2219_v40  ;;  %v337_v26 = vpop.f32.mrb[19].mxu0  ;;  %v697_v27 = vpop.f32.mrb[19].mxu1 }
 0x11d   :  { %1126 = vst [vmem:[%s2787_s3 + $0x80] sm:$0xff] %v982_v20  ;;  %1198 = vst [vmem:[%s2787_s3 + $0x2c0] sm:$0xff] %v1054_v21  ;;  %v338_v28 = vadd.f32 %v2219_v40, %v337_v26  ;;  %v698_v29 = vadd.f32 %v2219_v40, %v697_v27 }
 0x11e   :  { %v985_v30 = vmax.f32 %v343_v24, 0.0  ;;  %v1057_v31 = vmax.f32 %v703_v25, 0.0 }
 0x11f   :  { %v984_v32 = vmax.f32 %v338_v28, 0.0  ;;  %v1056_v33 = vmax.f32 %v698_v29, 0.0  ;;  %v1483_v34 = vpop.f32.mrb[20].mxu0  ;;  %v1591_v35 = vpop.f32.mrb[20].mxu1 }
 0x120   :  { %1129 = vst [vmem:[%s2787_s3 + $0x98] sm:$0xff] %v985_v30  ;;  %1201 = vst [vmem:[%s2787_s3 + $0x2d8] sm:$0xff] %v1057_v31  ;;  %v353_v36 = vadd.f32 %v1483_v34, %v2219_v40  ;;  %v713_v37 = vadd.f32 %v1591_v35, %v2219_v40  ;;  %v347_v38 = vpop.f32.mrb[21].mxu0  ;;  %v707_v39 = vpop.f32.mrb[21].mxu1 }
 0x121   :  { %1128 = vst [vmem:[%s2787_s3 + $0x90] sm:$0xff] %v984_v32  ;;  %1200 = vst [vmem:[%s2787_s3 + $0x2d0] sm:$0xff] %v1056_v33  ;;  %v348_v41 = vadd.f32 %v2219_v40, %v347_v38  ;;  %v708_v42 = vadd.f32 %v2219_v40, %v707_v39 }
 0x122   :  { %v987_v43 = vmax.f32 %v353_v36, 0.0  ;;  %v1059_v44 = vmax.f32 %v713_v37, 0.0 }
 0x123   :  { %v986_v45 = vmax.f32 %v348_v41, 0.0  ;;  %v1058_v46 = vmax.f32 %v708_v42, 0.0  ;;  %v1486_v47 = vpop.f32.mrb[22].mxu0  ;;  %v1594_v48 = vpop.f32.mrb[22].mxu1 }
 0x124   :  { %1131 = vst [vmem:[%s2787_s3 + $0xa8] sm:$0xff] %v987_v43  ;;  %1203 = vst [vmem:[%s2787_s3 + $0x2e8] sm:$0xff] %v1059_v44  ;;  %v363_v49 = vadd.f32 %v1486_v47, %v2219_v40  ;;  %v723_v50 = vadd.f32 %v1594_v48, %v2219_v40  ;;  %v357_v51 = vpop.f32.mrb[23].mxu0  ;;  %v717_v52 = vpop.f32.mrb[23].mxu1 }
 0x125   :  { %1130 = vst [vmem:[%s2787_s3 + $0xa0] sm:$0xff] %v986_v45  ;;  %1202 = vst [vmem:[%s2787_s3 + $0x2e0] sm:$0xff] %v1058_v46  ;;  %v358_v53 = vadd.f32 %v2219_v40, %v357_v51  ;;  %v718_v54 = vadd.f32 %v2219_v40, %v717_v52 }
 0x126   :  { %v989_v55 = vmax.f32 %v363_v49, 0.0  ;;  %v1061_v56 = vmax.f32 %v723_v50, 0.0 }
 0x127   :  { %v988_v57 = vmax.f32 %v358_v53, 0.0  ;;  %v1060_v58 = vmax.f32 %v718_v54, 0.0  ;;  %v1489_v59 = vpop.f32.mrb[24].mxu0  ;;  %v1597_v60 = vpop.f32.mrb[24].mxu1 }
 0x128   :  { %1133 = vst [vmem:[%s2787_s3 + $0xb8] sm:$0xff] %v989_v55  ;;  %1205 = vst [vmem:[%s2787_s3 + $0x2f8] sm:$0xff] %v1061_v56  ;;  %v373_v61 = vadd.f32 %v1489_v59, %v2219_v40  ;;  %v733_v62 = vadd.f32 %v1597_v60, %v2219_v40  ;;  %v367_v63 = vpop.f32.mrb[25].mxu0  ;;  %v727_v0 = vpop.f32.mrb[25].mxu1 }
 0x129   :  { %1132 = vst [vmem:[%s2787_s3 + $0xb0] sm:$0xff] %v988_v57  ;;  %1204 = vst [vmem:[%s2787_s3 + $0x2f0] sm:$0xff] %v1060_v58  ;;  %v368_v1 = vadd.f32 %v2219_v40, %v367_v63  ;;  %v728_v2 = vadd.f32 %v2219_v40, %v727_v0 }
 0x12a   :  { %v991_v3 = vmax.f32 %v373_v61, 0.0  ;;  %v1063_v4 = vmax.f32 %v733_v62, 0.0 }
 0x12b   :  { %v990_v5 = vmax.f32 %v368_v1, 0.0  ;;  %v1062_v6 = vmax.f32 %v728_v2, 0.0  ;;  %v1492_v7 = vpop.f32.mrb[26].mxu0  ;;  %v1600_v8 = vpop.f32.mrb[26].mxu1 }
 0x12c   :  { %1135 = vst [vmem:[%s2787_s3 + $0xc8] sm:$0xff] %v991_v3  ;;  %1207 = vst [vmem:[%s2787_s3 + $0x308] sm:$0xff] %v1063_v4  ;;  %v383_v9 = vadd.f32 %v1492_v7, %v2219_v40  ;;  %v743_v10 = vadd.f32 %v1600_v8, %v2219_v40  ;;  %v377_v11 = vpop.f32.mrb[27].mxu0  ;;  %v737_v12 = vpop.f32.mrb[27].mxu1 }
 0x12d   :  { %1134 = vst [vmem:[%s2787_s3 + $0xc0] sm:$0xff] %v990_v5  ;;  %1206 = vst [vmem:[%s2787_s3 + $0x300] sm:$0xff] %v1062_v6  ;;  %v378_v13 = vadd.f32 %v2219_v40, %v377_v11  ;;  %v738_v14 = vadd.f32 %v2219_v40, %v737_v12 }
 0x12e   :  { %v993_v15 = vmax.f32 %v383_v9, 0.0  ;;  %v1065_v16 = vmax.f32 %v743_v10, 0.0 }
 0x12f   :  { %v992_v17 = vmax.f32 %v378_v13, 0.0  ;;  %v1064_v18 = vmax.f32 %v738_v14, 0.0  ;;  %v1495_v19 = vpop.f32.mrb[28].mxu0  ;;  %v1603_v20 = vpop.f32.mrb[28].mxu1 }
 0x130   :  { %1137 = vst [vmem:[%s2787_s3 + $0xd8] sm:$0xff] %v993_v15  ;;  %1209 = vst [vmem:[%s2787_s3 + $0x318] sm:$0xff] %v1065_v16  ;;  %v393_v21 = vadd.f32 %v1495_v19, %v2219_v40  ;;  %v753_v22 = vadd.f32 %v1603_v20, %v2219_v40  ;;  %v387_v23 = vpop.f32.mrb[29].mxu0  ;;  %v747_v24 = vpop.f32.mrb[29].mxu1 }
 0x131   :  { %1136 = vst [vmem:[%s2787_s3 + $0xd0] sm:$0xff] %v992_v17  ;;  %1208 = vst [vmem:[%s2787_s3 + $0x310] sm:$0xff] %v1064_v18  ;;  %v388_v25 = vadd.f32 %v2219_v40, %v387_v23  ;;  %v748_v26 = vadd.f32 %v2219_v40, %v747_v24 }
 0x132   :  { %v995_v27 = vmax.f32 %v393_v21, 0.0  ;;  %v1067_v28 = vmax.f32 %v753_v22, 0.0 }
 0x133   :  { %v994_v29 = vmax.f32 %v388_v25, 0.0  ;;  %v1066_v30 = vmax.f32 %v748_v26, 0.0  ;;  %v1498_v31 = vpop.f32.mrb[30].mxu0  ;;  %v1606_v32 = vpop.f32.mrb[30].mxu1 }
 0x134   :  { %1139 = vst [vmem:[%s2787_s3 + $0xe8] sm:$0xff] %v995_v27  ;;  %1211 = vst [vmem:[%s2787_s3 + $0x328] sm:$0xff] %v1067_v28  ;;  %v403_v33 = vadd.f32 %v1498_v31, %v2219_v40  ;;  %v763_v34 = vadd.f32 %v1606_v32, %v2219_v40  ;;  %v397_v35 = vpop.f32.mrb[31].mxu0  ;;  %v757_v36 = vpop.f32.mrb[31].mxu1 }
 0x135   :  { %1138 = vst [vmem:[%s2787_s3 + $0xe0] sm:$0xff] %v994_v29  ;;  %1210 = vst [vmem:[%s2787_s3 + $0x320] sm:$0xff] %v1066_v30  ;;  %v398_v37 = vadd.f32 %v2219_v40, %v397_v35  ;;  %v758_v38 = vadd.f32 %v2219_v40, %v757_v36 }
 0x136   :  { %v997_v39 = vmax.f32 %v403_v33, 0.0  ;;  %v1069_v41 = vmax.f32 %v763_v34, 0.0 }
 0x137   :  { %v996_v42 = vmax.f32 %v398_v37, 0.0  ;;  %v1068_v43 = vmax.f32 %v758_v38, 0.0  ;;  %v1501_v44 = vpop.f32.mrb[32].mxu0  ;;  %v1609_v45 = vpop.f32.mrb[32].mxu1 }
 0x138   :  { %1141 = vst [vmem:[%s2787_s3 + $0xf8] sm:$0xff] %v997_v39  ;;  %1213 = vst [vmem:[%s2787_s3 + $0x338] sm:$0xff] %v1069_v41  ;;  %v413_v46 = vadd.f32 %v1501_v44, %v2219_v40  ;;  %v773_v47 = vadd.f32 %v1609_v45, %v2219_v40  ;;  %v407_v48 = vpop.f32.mrb[33].mxu0  ;;  %v767_v49 = vpop.f32.mrb[33].mxu1 }
 0x139   :  { %1140 = vst [vmem:[%s2787_s3 + $0xf0] sm:$0xff] %v996_v42  ;;  %1212 = vst [vmem:[%s2787_s3 + $0x330] sm:$0xff] %v1068_v43  ;;  %v408_v50 = vadd.f32 %v2219_v40, %v407_v48  ;;  %v768_v51 = vadd.f32 %v2219_v40, %v767_v49 }
 0x13a   :  { %v999_v52 = vmax.f32 %v413_v46, 0.0  ;;  %v1071_v53 = vmax.f32 %v773_v47, 0.0 }
 0x13b   :  { %v998_v54 = vmax.f32 %v408_v50, 0.0  ;;  %v1070_v55 = vmax.f32 %v768_v51, 0.0  ;;  %v1504_v56 = vpop.f32.mrb[34].mxu0  ;;  %v1612_v57 = vpop.f32.mrb[34].mxu1 }
 0x13c   :  { %1143 = vst [vmem:[%s2787_s3 + $0x108] sm:$0xff] %v999_v52  ;;  %1215 = vst [vmem:[%s2787_s3 + $0x348] sm:$0xff] %v1071_v53  ;;  %v423_v58 = vadd.f32 %v1504_v56, %v2219_v40  ;;  %v783_v59 = vadd.f32 %v1612_v57, %v2219_v40  ;;  %v417_v60 = vpop.f32.mrb[35].mxu0  ;;  %v777_v61 = vpop.f32.mrb[35].mxu1 }
 0x13d   :  { %1142 = vst [vmem:[%s2787_s3 + $0x100] sm:$0xff] %v998_v54  ;;  %1214 = vst [vmem:[%s2787_s3 + $0x340] sm:$0xff] %v1070_v55  ;;  %v418_v62 = vadd.f32 %v2219_v40, %v417_v60  ;;  %v778_v63 = vadd.f32 %v2219_v40, %v777_v61 }
 0x13e   :  { %v1001_v0 = vmax.f32 %v423_v58, 0.0  ;;  %v1073_v1 = vmax.f32 %v783_v59, 0.0 }
 0x13f   :  { %v1000_v2 = vmax.f32 %v418_v62, 0.0  ;;  %v1072_v3 = vmax.f32 %v778_v63, 0.0  ;;  %v1507_v4 = vpop.f32.mrb[36].mxu0  ;;  %v1615_v5 = vpop.f32.mrb[36].mxu1 }
 0x140   :  { %1145 = vst [vmem:[%s2787_s3 + $0x118] sm:$0xff] %v1001_v0  ;;  %1217 = vst [vmem:[%s2787_s3 + $0x358] sm:$0xff] %v1073_v1  ;;  %v433_v6 = vadd.f32 %v1507_v4, %v2219_v40  ;;  %v793_v7 = vadd.f32 %v1615_v5, %v2219_v40  ;;  %v427_v8 = vpop.f32.mrb[37].mxu0  ;;  %v787_v9 = vpop.f32.mrb[37].mxu1 }
 0x141   :  { %1144 = vst [vmem:[%s2787_s3 + $0x110] sm:$0xff] %v1000_v2  ;;  %1216 = vst [vmem:[%s2787_s3 + $0x350] sm:$0xff] %v1072_v3  ;;  %v428_v10 = vadd.f32 %v2219_v40, %v427_v8  ;;  %v788_v11 = vadd.f32 %v2219_v40, %v787_v9 }
 0x142   :  { %v1003_v12 = vmax.f32 %v433_v6, 0.0  ;;  %v1075_v13 = vmax.f32 %v793_v7, 0.0 }
 0x143   :  { %v1002_v14 = vmax.f32 %v428_v10, 0.0  ;;  %v1074_v15 = vmax.f32 %v788_v11, 0.0  ;;  %v1510_v16 = vpop.f32.mrb[38].mxu0  ;;  %v1618_v17 = vpop.f32.mrb[38].mxu1 }
 0x144   :  { %1147 = vst [vmem:[%s2787_s3 + $0x128] sm:$0xff] %v1003_v12  ;;  %1219 = vst [vmem:[%s2787_s3 + $0x368] sm:$0xff] %v1075_v13  ;;  %v443_v18 = vadd.f32 %v1510_v16, %v2219_v40  ;;  %v803_v19 = vadd.f32 %v1618_v17, %v2219_v40  ;;  %v437_v20 = vpop.f32.mrb[39].mxu0  ;;  %v797_v21 = vpop.f32.mrb[39].mxu1 }
 0x145   :  { %1146 = vst [vmem:[%s2787_s3 + $0x120] sm:$0xff] %v1002_v14  ;;  %1218 = vst [vmem:[%s2787_s3 + $0x360] sm:$0xff] %v1074_v15  ;;  %v438_v22 = vadd.f32 %v2219_v40, %v437_v20  ;;  %v798_v23 = vadd.f32 %v2219_v40, %v797_v21 }
 0x146   :  { %v1005_v24 = vmax.f32 %v443_v18, 0.0  ;;  %v1077_v25 = vmax.f32 %v803_v19, 0.0 }
 0x147   :  { %v1004_v26 = vmax.f32 %v438_v22, 0.0  ;;  %v1076_v27 = vmax.f32 %v798_v23, 0.0  ;;  %v1513_v28 = vpop.f32.mrb[40].mxu0  ;;  %v1621_v29 = vpop.f32.mrb[40].mxu1 }
 0x148   :  { %1149 = vst [vmem:[%s2787_s3 + $0x138] sm:$0xff] %v1005_v24  ;;  %1221 = vst [vmem:[%s2787_s3 + $0x378] sm:$0xff] %v1077_v25  ;;  %v453_v30 = vadd.f32 %v1513_v28, %v2219_v40  ;;  %v813_v31 = vadd.f32 %v1621_v29, %v2219_v40  ;;  %v447_v32 = vpop.f32.mrb[41].mxu0  ;;  %v807_v33 = vpop.f32.mrb[41].mxu1 }
 0x149   :  { %1148 = vst [vmem:[%s2787_s3 + $0x130] sm:$0xff] %v1004_v26  ;;  %1220 = vst [vmem:[%s2787_s3 + $0x370] sm:$0xff] %v1076_v27  ;;  %v448_v34 = vadd.f32 %v2219_v40, %v447_v32  ;;  %v808_v35 = vadd.f32 %v2219_v40, %v807_v33 }
 0x14a   :  { %v1007_v36 = vmax.f32 %v453_v30, 0.0  ;;  %v1079_v37 = vmax.f32 %v813_v31, 0.0 }
 0x14b   :  { %v1006_v38 = vmax.f32 %v448_v34, 0.0  ;;  %v1078_v39 = vmax.f32 %v808_v35, 0.0  ;;  %v1516_v41 = vpop.f32.mrb[42].mxu0  ;;  %v1624_v42 = vpop.f32.mrb[42].mxu1 }
 0x14c   :  { %1151 = vst [vmem:[%s2787_s3 + $0x148] sm:$0xff] %v1007_v36  ;;  %1223 = vst [vmem:[%s2787_s3 + $0x388] sm:$0xff] %v1079_v37  ;;  %v463_v43 = vadd.f32 %v1516_v41, %v2219_v40  ;;  %v823_v44 = vadd.f32 %v1624_v42, %v2219_v40  ;;  %v457_v45 = vpop.f32.mrb[43].mxu0  ;;  %v817_v46 = vpop.f32.mrb[43].mxu1 }
 0x14d   :  { %1150 = vst [vmem:[%s2787_s3 + $0x140] sm:$0xff] %v1006_v38  ;;  %1222 = vst [vmem:[%s2787_s3 + $0x380] sm:$0xff] %v1078_v39  ;;  %v458_v47 = vadd.f32 %v2219_v40, %v457_v45  ;;  %v818_v48 = vadd.f32 %v2219_v40, %v817_v46 }
 0x14e   :  { %v1009_v49 = vmax.f32 %v463_v43, 0.0  ;;  %v1081_v50 = vmax.f32 %v823_v44, 0.0 }
 0x14f   :  { %v1008_v51 = vmax.f32 %v458_v47, 0.0  ;;  %v1080_v52 = vmax.f32 %v818_v48, 0.0  ;;  %v1519_v53 = vpop.f32.mrb[44].mxu0  ;;  %v1627_v54 = vpop.f32.mrb[44].mxu1 }
 0x150   :  { %1153 = vst [vmem:[%s2787_s3 + $0x158] sm:$0xff] %v1009_v49  ;;  %1225 = vst [vmem:[%s2787_s3 + $0x398] sm:$0xff] %v1081_v50  ;;  %v473_v55 = vadd.f32 %v1519_v53, %v2219_v40  ;;  %v833_v56 = vadd.f32 %v1627_v54, %v2219_v40  ;;  %v467_v57 = vpop.f32.mrb[45].mxu0  ;;  %v827_v58 = vpop.f32.mrb[45].mxu1 }
 0x151   :  { %1152 = vst [vmem:[%s2787_s3 + $0x150] sm:$0xff] %v1008_v51  ;;  %1224 = vst [vmem:[%s2787_s3 + $0x390] sm:$0xff] %v1080_v52  ;;  %v468_v59 = vadd.f32 %v2219_v40, %v467_v57  ;;  %v828_v60 = vadd.f32 %v2219_v40, %v827_v58 }
 0x152   :  { %v1011_v61 = vmax.f32 %v473_v55, 0.0  ;;  %v1083_v62 = vmax.f32 %v833_v56, 0.0 }
 0x153   :  { %v1010_v63 = vmax.f32 %v468_v59, 0.0  ;;  %v1082_v0 = vmax.f32 %v828_v60, 0.0  ;;  %v1522_v1 = vpop.f32.mrb[46].mxu0  ;;  %v1630_v2 = vpop.f32.mrb[46].mxu1 }
 0x154   :  { %1155 = vst [vmem:[%s2787_s3 + $0x168] sm:$0xff] %v1011_v61  ;;  %1227 = vst [vmem:[%s2787_s3 + $0x3a8] sm:$0xff] %v1083_v62  ;;  %v483_v3 = vadd.f32 %v1522_v1, %v2219_v40  ;;  %v843_v4 = vadd.f32 %v1630_v2, %v2219_v40  ;;  %v477_v5 = vpop.f32.mrb[47].mxu0  ;;  %v837_v6 = vpop.f32.mrb[47].mxu1 }
 0x155   :  { %1154 = vst [vmem:[%s2787_s3 + $0x160] sm:$0xff] %v1010_v63  ;;  %1226 = vst [vmem:[%s2787_s3 + $0x3a0] sm:$0xff] %v1082_v0  ;;  %v478_v7 = vadd.f32 %v2219_v40, %v477_v5  ;;  %v838_v8 = vadd.f32 %v2219_v40, %v837_v6 }
 0x156   :  { %v1013_v9 = vmax.f32 %v483_v3, 0.0  ;;  %v1085_v10 = vmax.f32 %v843_v4, 0.0 }
 0x157   :  { %v1012_v11 = vmax.f32 %v478_v7, 0.0  ;;  %v1084_v12 = vmax.f32 %v838_v8, 0.0  ;;  %v1525_v13 = vpop.f32.mrb[48].mxu0  ;;  %v1633_v14 = vpop.f32.mrb[48].mxu1 }
 0x158   :  { %1157 = vst [vmem:[%s2787_s3 + $0x178] sm:$0xff] %v1013_v9  ;;  %1229 = vst [vmem:[%s2787_s3 + $0x3b8] sm:$0xff] %v1085_v10  ;;  %v493_v15 = vadd.f32 %v1525_v13, %v2219_v40  ;;  %v853_v16 = vadd.f32 %v1633_v14, %v2219_v40  ;;  %v487_v17 = vpop.f32.mrb[49].mxu0  ;;  %v847_v18 = vpop.f32.mrb[49].mxu1 }
 0x159   :  { %1156 = vst [vmem:[%s2787_s3 + $0x170] sm:$0xff] %v1012_v11  ;;  %1228 = vst [vmem:[%s2787_s3 + $0x3b0] sm:$0xff] %v1084_v12  ;;  %v488_v19 = vadd.f32 %v2219_v40, %v487_v17  ;;  %v848_v20 = vadd.f32 %v2219_v40, %v847_v18 }
 0x15a   :  { %v1015_v21 = vmax.f32 %v493_v15, 0.0  ;;  %v1087_v22 = vmax.f32 %v853_v16, 0.0 }
 0x15b   :  { %v1014_v23 = vmax.f32 %v488_v19, 0.0  ;;  %v1086_v24 = vmax.f32 %v848_v20, 0.0  ;;  %v1528_v25 = vpop.f32.mrb[50].mxu0  ;;  %v1636_v26 = vpop.f32.mrb[50].mxu1 }
 0x15c   :  { %1159 = vst [vmem:[%s2787_s3 + $0x188] sm:$0xff] %v1015_v21  ;;  %1231 = vst [vmem:[%s2787_s3 + $0x3c8] sm:$0xff] %v1087_v22  ;;  %v503_v27 = vadd.f32 %v1528_v25, %v2219_v40  ;;  %v863_v28 = vadd.f32 %v1636_v26, %v2219_v40  ;;  %v497_v29 = vpop.f32.mrb[51].mxu0  ;;  %v857_v30 = vpop.f32.mrb[51].mxu1 }
 0x15d   :  { %1158 = vst [vmem:[%s2787_s3 + $0x180] sm:$0xff] %v1014_v23  ;;  %1230 = vst [vmem:[%s2787_s3 + $0x3c0] sm:$0xff] %v1086_v24  ;;  %v498_v31 = vadd.f32 %v2219_v40, %v497_v29  ;;  %v858_v32 = vadd.f32 %v2219_v40, %v857_v30 }
 0x15e   :  { %v1017_v33 = vmax.f32 %v503_v27, 0.0  ;;  %v1089_v34 = vmax.f32 %v863_v28, 0.0 }
 0x15f   :  { %v1016_v35 = vmax.f32 %v498_v31, 0.0  ;;  %v1088_v36 = vmax.f32 %v858_v32, 0.0  ;;  %v1531_v37 = vpop.f32.mrb[52].mxu0  ;;  %v1639_v38 = vpop.f32.mrb[52].mxu1 }
 0x160   :  { %1161 = vst [vmem:[%s2787_s3 + $0x198] sm:$0xff] %v1017_v33  ;;  %1233 = vst [vmem:[%s2787_s3 + $0x3d8] sm:$0xff] %v1089_v34  ;;  %v513_v39 = vadd.f32 %v1531_v37, %v2219_v40  ;;  %v873_v41 = vadd.f32 %v1639_v38, %v2219_v40  ;;  %v507_v42 = vpop.f32.mrb[53].mxu0  ;;  %v867_v43 = vpop.f32.mrb[53].mxu1 }
 0x161   :  { %1160 = vst [vmem:[%s2787_s3 + $0x190] sm:$0xff] %v1016_v35  ;;  %1232 = vst [vmem:[%s2787_s3 + $0x3d0] sm:$0xff] %v1088_v36  ;;  %v508_v44 = vadd.f32 %v2219_v40, %v507_v42  ;;  %v868_v45 = vadd.f32 %v2219_v40, %v867_v43 }
 0x162   :  { %v1019_v46 = vmax.f32 %v513_v39, 0.0  ;;  %v1091_v47 = vmax.f32 %v873_v41, 0.0 }
 0x163   :  { %v1018_v48 = vmax.f32 %v508_v44, 0.0  ;;  %v1090_v49 = vmax.f32 %v868_v45, 0.0  ;;  %v1534_v50 = vpop.f32.mrb[54].mxu0  ;;  %v1642_v51 = vpop.f32.mrb[54].mxu1 }
 0x164   :  { %1163 = vst [vmem:[%s2787_s3 + $0x1a8] sm:$0xff] %v1019_v46  ;;  %1235 = vst [vmem:[%s2787_s3 + $0x3e8] sm:$0xff] %v1091_v47  ;;  %v523_v52 = vadd.f32 %v1534_v50, %v2219_v40  ;;  %v883_v53 = vadd.f32 %v1642_v51, %v2219_v40  ;;  %v517_v54 = vpop.f32.mrb[55].mxu0  ;;  %v877_v55 = vpop.f32.mrb[55].mxu1 }
 0x165   :  { %1162 = vst [vmem:[%s2787_s3 + $0x1a0] sm:$0xff] %v1018_v48  ;;  %1234 = vst [vmem:[%s2787_s3 + $0x3e0] sm:$0xff] %v1090_v49  ;;  %v518_v56 = vadd.f32 %v2219_v40, %v517_v54  ;;  %v878_v57 = vadd.f32 %v2219_v40, %v877_v55  ;;  %v1715_v49 = vld [vmem:[%s2786_s2] ss:$0 sm:$0xff] }
 0x166   :  { %v1021_v58 = vmax.f32 %v523_v52, 0.0  ;;  %v1093_v59 = vmax.f32 %v883_v53, 0.0 }
 0x167   :  { %v1020_v60 = vmax.f32 %v518_v56, 0.0  ;;  %v1092_v61 = vmax.f32 %v878_v57, 0.0  ;;  %v1537_v62 = vpop.f32.mrb[56].mxu0  ;;  %v1645_v63 = vpop.f32.mrb[56].mxu1 }
 0x168   :  { %1165 = vst [vmem:[%s2787_s3 + $0x1b8] sm:$0xff] %v1021_v58  ;;  %1237 = vst [vmem:[%s2787_s3 + $0x3f8] sm:$0xff] %v1093_v59  ;;  %v533_v0 = vadd.f32 %v1537_v62, %v2219_v40  ;;  %v893_v1 = vadd.f32 %v1645_v63, %v2219_v40  ;;  %v527_v2 = vpop.f32.mrb[57].mxu0  ;;  %v887_v3 = vpop.f32.mrb[57].mxu1 }
 0x169   :  { %1164 = vst [vmem:[%s2787_s3 + $0x1b0] sm:$0xff] %v1020_v60  ;;  %1236 = vst [vmem:[%s2787_s3 + $0x3f0] sm:$0xff] %v1092_v61  ;;  %v528_v4 = vadd.f32 %v2219_v40, %v527_v2  ;;  %v888_v5 = vadd.f32 %v2219_v40, %v887_v3 }
 0x16a   :  { %v1023_v6 = vmax.f32 %v533_v0, 0.0  ;;  %v1095_v7 = vmax.f32 %v893_v1, 0.0 }
 0x16b   :  { %v1022_v8 = vmax.f32 %v528_v4, 0.0  ;;  %v1094_v9 = vmax.f32 %v888_v5, 0.0  ;;  %v1540_v10 = vpop.f32.mrb[58].mxu0  ;;  %v1648_v11 = vpop.f32.mrb[58].mxu1 }
 0x16c   :  { %1167 = vst [vmem:[%s2787_s3 + $0x1c8] sm:$0xff] %v1023_v6  ;;  %1239 = vst [vmem:[%s2787_s3 + $0x408] sm:$0xff] %v1095_v7  ;;  %v543_v12 = vadd.f32 %v1540_v10, %v2219_v40  ;;  %v903_v13 = vadd.f32 %v1648_v11, %v2219_v40  ;;  %v537_v14 = vpop.f32.mrb[59].mxu0  ;;  %v897_v15 = vpop.f32.mrb[59].mxu1 }
 0x16d   :  { %1166 = vst [vmem:[%s2787_s3 + $0x1c0] sm:$0xff] %v1022_v8  ;;  %1238 = vst [vmem:[%s2787_s3 + $0x400] sm:$0xff] %v1094_v9  ;;  %v538_v16 = vadd.f32 %v2219_v40, %v537_v14  ;;  %v898_v17 = vadd.f32 %v2219_v40, %v897_v15 }
 0x16e   :  { %v1025_v18 = vmax.f32 %v543_v12, 0.0  ;;  %v1097_v19 = vmax.f32 %v903_v13, 0.0 }
 0x16f   :  { %v1024_v20 = vmax.f32 %v538_v16, 0.0  ;;  %v1096_v21 = vmax.f32 %v898_v17, 0.0  ;;  %v1543_v22 = vpop.f32.mrb[60].mxu0  ;;  %v1651_v23 = vpop.f32.mrb[60].mxu1 }
 0x170   :  { %1169 = vst [vmem:[%s2787_s3 + $0x1d8] sm:$0xff] %v1025_v18  ;;  %1241 = vst [vmem:[%s2787_s3 + $0x418] sm:$0xff] %v1097_v19  ;;  %v553_v24 = vadd.f32 %v1543_v22, %v2219_v40  ;;  %v913_v25 = vadd.f32 %v1651_v23, %v2219_v40  ;;  %v547_v26 = vpop.f32.mrb[61].mxu0  ;;  %v907_v27 = vpop.f32.mrb[61].mxu1 }
 0x171   :  { %1168 = vst [vmem:[%s2787_s3 + $0x1d0] sm:$0xff] %v1024_v20  ;;  %1240 = vst [vmem:[%s2787_s3 + $0x410] sm:$0xff] %v1096_v21  ;;  %v548_v28 = vadd.f32 %v2219_v40, %v547_v26  ;;  %v908_v29 = vadd.f32 %v2219_v40, %v907_v27 }
 0x172   :  { %v1027_v30 = vmax.f32 %v553_v24, 0.0  ;;  %v1099_v31 = vmax.f32 %v913_v25, 0.0 }
 0x173   :  { %v1026_v32 = vmax.f32 %v548_v28, 0.0  ;;  %v1098_v33 = vmax.f32 %v908_v29, 0.0  ;;  %v1546_v34 = vpop.f32.mrb[62].mxu0  ;;  %v1654_v35 = vpop.f32.mrb[62].mxu1 }
 0x174   :  { %1171 = vst [vmem:[%s2787_s3 + $0x1e8] sm:$0xff] %v1027_v30  ;;  %1243 = vst [vmem:[%s2787_s3 + $0x428] sm:$0xff] %v1099_v31  ;;  %v563_v36 = vadd.f32 %v1546_v34, %v2219_v40  ;;  %v923_v37 = vadd.f32 %v1654_v35, %v2219_v40  ;;  %v557_v38 = vpop.f32.mrb[63].mxu0  ;;  %v917_v39 = vpop.f32.mrb[63].mxu1 }
 0x175   :  { %1170 = vst [vmem:[%s2787_s3 + $0x1e0] sm:$0xff] %v1026_v32  ;;  %1242 = vst [vmem:[%s2787_s3 + $0x420] sm:$0xff] %v1098_v33  ;;  %v558_v41 = vadd.f32 %v2219_v40, %v557_v38  ;;  %v918_v42 = vadd.f32 %v2219_v40, %v917_v39 }
 0x176   :  { %v1029_v43 = vmax.f32 %v563_v36, 0.0  ;;  %v1101_v44 = vmax.f32 %v923_v37, 0.0 }
 0x177   :  { %v1028_v45 = vmax.f32 %v558_v41, 0.0  ;;  %v1100_v46 = vmax.f32 %v918_v42, 0.0  ;;  %v1549_v47 = vpop.f32.mrb[64].mxu0  ;;  %v1657_v48 = vpop.f32.mrb[64].mxu1 }
 0x178   :  { %1173 = vst [vmem:[%s2787_s3 + $0x1f8] sm:$0xff] %v1029_v43  ;;  %1245 = vst [vmem:[%s2787_s3 + $0x438] sm:$0xff] %v1101_v44  ;;  %v573_v50 = vadd.f32 %v1715_v49, %v1549_v47  ;;  %v933_v40 = vadd.f32 %v1715_v49, %v1657_v48  ;;  %v567_v51 = vpop.f32.mrb[65].mxu0  ;;  %v927_v52 = vpop.f32.mrb[65].mxu1 }
 0x179   :  { %1172 = vst [vmem:[%s2787_s3 + $0x1f0] sm:$0xff] %v1028_v45  ;;  %1244 = vst [vmem:[%s2787_s3 + $0x430] sm:$0xff] %v1100_v46  ;;  %v568_v53 = vadd.f32 %v1715_v49, %v567_v51  ;;  %v928_v54 = vadd.f32 %v1715_v49, %v927_v52 }
 0x17a   :  { %v1031_v55 = vmax.f32 %v573_v50, 0.0  ;;  %v1103_v56 = vmax.f32 %v933_v40, 0.0 }
 0x17b   :  { %v1030_v57 = vmax.f32 %v568_v53, 0.0  ;;  %v1102_v58 = vmax.f32 %v928_v54, 0.0  ;;  %v1552_v59 = vpop.f32.mrb[66].mxu0  ;;  %v1660_v60 = vpop.f32.mrb[66].mxu1 }
 0x17c   :  { %1175 = vst [vmem:[%s2787_s3 + $0x208] sm:$0xff] %v1031_v55  ;;  %1247 = vst [vmem:[%s2787_s3 + $0x448] sm:$0xff] %v1103_v56  ;;  %v583_v61 = vadd.f32 %v1715_v49, %v1552_v59  ;;  %v943_v62 = vadd.f32 %v1715_v49, %v1660_v60  ;;  %v577_v63 = vpop.f32.mrb[67].mxu0  ;;  %v937_v0 = vpop.f32.mrb[67].mxu1 }
 0x17d   :  { %1174 = vst [vmem:[%s2787_s3 + $0x200] sm:$0xff] %v1030_v57  ;;  %1246 = vst [vmem:[%s2787_s3 + $0x440] sm:$0xff] %v1102_v58  ;;  %v578_v1 = vadd.f32 %v1715_v49, %v577_v63  ;;  %v938_v2 = vadd.f32 %v1715_v49, %v937_v0 }
 0x17e   :  { %v1033_v3 = vmax.f32 %v583_v61, 0.0  ;;  %v1105_v4 = vmax.f32 %v943_v62, 0.0 }
 0x17f   :  { %v1032_v5 = vmax.f32 %v578_v1, 0.0  ;;  %v1104_v6 = vmax.f32 %v938_v2, 0.0  ;;  %v1555_v7 = vpop.f32.mrb[68].mxu0  ;;  %v1663_v8 = vpop.f32.mrb[68].mxu1 }
 0x180   :  { %1177 = vst [vmem:[%s2787_s3 + $0x218] sm:$0xff] %v1033_v3  ;;  %1249 = vst [vmem:[%s2787_s3 + $0x458] sm:$0xff] %v1105_v4  ;;  %v593_v9 = vadd.f32 %v1715_v49, %v1555_v7  ;;  %v953_v10 = vadd.f32 %v1715_v49, %v1663_v8  ;;  %v587_v11 = vpop.f32.mrb[69].mxu0  ;;  %v947_v12 = vpop.f32.mrb[69].mxu1 }
 0x181   :  { %1176 = vst [vmem:[%s2787_s3 + $0x210] sm:$0xff] %v1032_v5  ;;  %1248 = vst [vmem:[%s2787_s3 + $0x450] sm:$0xff] %v1104_v6  ;;  %v588_v13 = vadd.f32 %v1715_v49, %v587_v11  ;;  %v948_v14 = vadd.f32 %v1715_v49, %v947_v12 }
 0x182   :  { %v1035_v15 = vmax.f32 %v593_v9, 0.0  ;;  %v1107_v16 = vmax.f32 %v953_v10, 0.0 }
 0x183   :  { %v1034_v17 = vmax.f32 %v588_v13, 0.0  ;;  %v1106_v18 = vmax.f32 %v948_v14, 0.0  ;;  %v1558_v19 = vpop.f32.mrb[70].mxu0  ;;  %v1666_v20 = vpop.f32.mrb[70].mxu1 }
 0x184   :  { %1179 = vst [vmem:[%s2787_s3 + $0x228] sm:$0xff] %v1035_v15  ;;  %1251 = vst [vmem:[%s2787_s3 + $0x468] sm:$0xff] %v1107_v16  ;;  %v603_v21 = vadd.f32 %v1715_v49, %v1558_v19  ;;  %v963_v22 = vadd.f32 %v1715_v49, %v1666_v20  ;;  %v597_v23 = vpop.f32.mrb[71].mxu0  ;;  %v957_v24 = vpop.f32.mrb[71].mxu1 }
 0x185   :  { %1178 = vst [vmem:[%s2787_s3 + $0x220] sm:$0xff] %v1034_v17  ;;  %1250 = vst [vmem:[%s2787_s3 + $0x460] sm:$0xff] %v1106_v18  ;;  %v598_v25 = vadd.f32 %v1715_v49, %v597_v23  ;;  %v958_v26 = vadd.f32 %v1715_v49, %v957_v24 }
 0x186   :  { %v1037_v27 = vmax.f32 %v603_v21, 0.0  ;;  %v1109_v28 = vmax.f32 %v963_v22, 0.0 }
 0x187   :  { %v1036_v29 = vmax.f32 %v598_v25, 0.0  ;;  %v1108_v30 = vmax.f32 %v958_v26, 0.0 }
 0x188   :  { %1181 = vst [vmem:[%s2787_s3 + $0x238] sm:$0xff] %v1037_v27  ;;  %1253 = vst [vmem:[%s2787_s3 + $0x478] sm:$0xff] %v1109_v28 }
 0x189   :  { %1180 = vst [vmem:[%s2787_s3 + $0x230] sm:$0xff] %v1036_v29  ;;  %1252 = vst [vmem:[%s2787_s3 + $0x470] sm:$0xff] %v1108_v30 }

// kernel: net_forward.4
= control target key start
LH: loop header
LB: loop body
LE: loop exit
PB: predicated region body
PF: predicated region fallthrough
CT: control target
= control target key end

     0   :  { %s676_s1 = inlined_call_operand.vmem [shape: f32[256,128], index: 1, kind: input, shape index: {}]   ;;  %s677_s0 = inlined_call_operand.vmem [shape: f32[128,256], index: 0, kind: input, shape index: {}]   ;;  %s678_s2 = inlined_call_operand.vmem [shape: f32[1,128], index: 2, kind: input, shape index: {}]   ;;  %s679_s3 = inlined_call_operand.vmem [shape: f32[128,128], index: 3, kind: output, shape index: {}]  }
   0x1   :  { %v62_v0 = vld [vmem:[%s676_s1 + $0x80] sm:$0xff]  ;;  %v63_v1 = vld [vmem:[%s676_s1 + $0x88] sm:$0xff]  ;;  %v64_v5 = vld [vmem:[%s676_s1 + $0x90] sm:$0xff] }
   0x2   :  { %v46_v2 = vld [vmem:[%s676_s1] sm:$0xff]  ;;  %v347_v3 = vpack.c.bf16 %v63_v1, %v62_v0  ;;  %v47_v4 = vld [vmem:[%s676_s1 + $0x8] sm:$0xff]  ;;  %v65_v6 = vld [vmem:[%s676_s1 + $0x98] sm:$0xff] }
   0x3   :  { %v349_v7 = vpack.c.bf16 %v47_v4, %v46_v2  ;;  %v351_v8 = vpack.c.bf16 %v65_v6, %v64_v5  ;;  %v48_v9 = vld [vmem:[%s676_s1 + $0x10] sm:$0xff]  ;;  %v49_v10 = vld [vmem:[%s676_s1 + $0x18] sm:$0xff]  ;;  %v66_v11 = vld [vmem:[%s676_s1 + $0xa0] sm:$0xff] }
   0x4   :  { %348 = vmatprep.subr.bf16.mxu0 %v347_v3  ;;  %379 = vmatprep.subr.bf16.mxu1 %v347_v3  ;;  %v67_v12 = vld [vmem:[%s676_s1 + $0xa8] sm:$0xff]  ;;  %v353_v13 = vpack.c.bf16 %v49_v10, %v48_v9  ;;  %v50_v15 = vld [vmem:[%s676_s1 + $0x20] sm:$0xff]  ;;  %v68_v17 = vld [vmem:[%s676_s1 + $0xb0] sm:$0xff] }
   0x5   :  { %350 = vmatpush3.bf16.msra.mxu0 %v349_v7  ;;  %387 = vmatpush3.bf16.msra.mxu1 %v349_v7  ;;  %v355_v14 = vpack.c.bf16 %v67_v12, %v66_v11  ;;  %v51_v16 = vld [vmem:[%s676_s1 + $0x28] sm:$0xff]  ;;  %v69_v18 = vld [vmem:[%s676_s1 + $0xb8] sm:$0xff]  ;;  %v52_v21 = vld [vmem:[%s676_s1 + $0x30] sm:$0xff] }
   0x6   :  { %352 = vmatprep.subr.bf16.mxu0 %v351_v8  ;;  %380 = vmatprep.subr.bf16.mxu1 %v351_v8  ;;  %v357_v19 = vpack.c.bf16 %v51_v16, %v50_v15  ;;  %v359_v20 = vpack.c.bf16 %v69_v18, %v68_v17  ;;  %v53_v22 = vld [vmem:[%s676_s1 + $0x38] sm:$0xff]  ;;  %v70_v23 = vld [vmem:[%s676_s1 + $0xc0] sm:$0xff]  ;;  %v71_v24 = vld [vmem:[%s676_s1 + $0xc8] sm:$0xff] }
   0x7   :  { %v15_v25 = vld [vmem:[%s677_s0 + $0x8] sm:$0xff]  ;;  %v361_v27 = vpack.c.bf16 %v53_v22, %v52_v21  ;;  %v363_v28 = vpack.c.bf16 %v71_v24, %v70_v23  ;;  %v54_v29 = vld [vmem:[%s676_s1 + $0x40] sm:$0xff]  ;;  %v72_v31 = vld [vmem:[%s676_s1 + $0xd0] sm:$0xff] }
   0x8   :  { %149 = vmatprep.mubr.f32.mxu0 %v15_v25  ;;  %v31_v26 = vld [vmem:[%s677_s0 + $0x88] sm:$0xff]  ;;  %v73_v32 = vld [vmem:[%s676_s1 + $0xd8] sm:$0xff]  ;;  %v56_v35 = vld [vmem:[%s676_s1 + $0x50] sm:$0xff] }
   0x9   :  { %354 = vmatpush3.bf16.msra.mxu0 %v353_v13  ;;  %388 = vmatpush3.bf16.msra.mxu1 %v353_v13  ;;  %v55_v30 = vld [vmem:[%s676_s1 + $0x48] sm:$0xff]  ;;  %v367_v34 = vpack.c.bf16 %v73_v32, %v72_v31  ;;  %v57_v36 = vld [vmem:[%s676_s1 + $0x58] sm:$0xff]  ;;  %v74_v37 = vld [vmem:[%s676_s1 + $0xe0] sm:$0xff] }
   0xa   :  { %356 = vmatprep.subr.bf16.mxu0 %v355_v14  ;;  %381 = vmatprep.subr.bf16.mxu1 %v355_v14  ;;  %v365_v33 = vpack.c.bf16 %v55_v30, %v54_v29  ;;  %v75_v38 = vld [vmem:[%s676_s1 + $0xe8] sm:$0xff]  ;;  %v369_v39 = vpack.c.bf16 %v57_v36, %v56_v35  ;;  %v58_v41 = vld [vmem:[%s676_s1 + $0x60] sm:$0xff]  ;;  %v76_v43 = vld [vmem:[%s676_s1 + $0xf0] sm:$0xff] }
   0xb   :  { %189 = vmatprep.mubr.f32.mxu1 %v31_v26  ;;  %v371_v40 = vpack.c.bf16 %v75_v38, %v74_v37  ;;  %v59_v42 = vld [vmem:[%s676_s1 + $0x68] sm:$0xff]  ;;  %v77_v44 = vld [vmem:[%s676_s1 + $0xf8] sm:$0xff]  ;;  %v60_v47 = vld [vmem:[%s676_s1 + $0x70] sm:$0xff] }
   0xc   :  { %v373_v45 = vpack.c.bf16 %v59_v42, %v58_v41  ;;  %v375_v46 = vpack.c.bf16 %v77_v44, %v76_v43  ;;  %v61_v48 = vld [vmem:[%s676_s1 + $0x78] sm:$0xff]  ;;  %v14_v50 = vld [vmem:[%s677_s0] sm:$0xff]  ;;  %v16_v54 = vld [vmem:[%s677_s0 + $0x10] sm:$0xff] }
   0xd   :  { %358 = vmatpush3.bf16.msra.mxu0 %v357_v19  ;;  %389 = vmatpush3.bf16.msra.mxu1 %v357_v19  ;;  %v377_v49 = vpack.c.bf16 %v61_v48, %v60_v47  ;;  %v30_v51 = vld [vmem:[%s677_s0 + $0x80] sm:$0xff]  ;;  %v17_v52 = vld [vmem:[%s677_s0 + $0x18] sm:$0xff]  ;;  %v32_v55 = vld [vmem:[%s677_s0 + $0x90] sm:$0xff] }
   0xe   :  { %360 = vmatprep.subr.bf16.mxu0 %v359_v20  ;;  %382 = vmatprep.subr.bf16.mxu1 %v359_v20  ;;  %v33_v53 = vld [vmem:[%s677_s0 + $0x98] sm:$0xff]  ;;  %v19_v56 = vld [vmem:[%s677_s0 + $0x28] sm:$0xff]  ;;  %v18_v58 = vld [vmem:[%s677_s0 + $0x20] sm:$0xff] }
   0xf   :  { %v35_v57 = vld [vmem:[%s677_s0 + $0xa8] sm:$0xff]  ;;  %v34_v59 = vld [vmem:[%s677_s0 + $0xa0] sm:$0xff]  ;;  %v21_v60 = vld [vmem:[%s677_s0 + $0x38] sm:$0xff] }
  0x10   :  { %v37_v61 = vld [vmem:[%s677_s0 + $0xb8] sm:$0xff]  ;;  %v20_v62 = vld [vmem:[%s677_s0 + $0x30] sm:$0xff]  ;;  %v23_v0 = vld [vmem:[%s677_s0 + $0x48] sm:$0xff] }
  0x11   :  { %362 = vmatpush3.bf16.msra.mxu0 %v361_v27  ;;  %390 = vmatpush3.bf16.msra.mxu1 %v361_v27  ;;  %v36_v63 = vld [vmem:[%s677_s0 + $0xb0] sm:$0xff]  ;;  %v39_v1 = vld [vmem:[%s677_s0 + $0xc8] sm:$0xff]  ;;  %v22_v2 = vld [vmem:[%s677_s0 + $0x40] sm:$0xff] }
  0x12   :  { %364 = vmatprep.subr.bf16.mxu0 %v363_v28  ;;  %383 = vmatprep.subr.bf16.mxu1 %v363_v28  ;;  %v38_v3 = vld [vmem:[%s677_s0 + $0xc0] sm:$0xff]  ;;  %v25_v4 = vld [vmem:[%s677_s0 + $0x58] sm:$0xff]  ;;  %v24_v6 = vld [vmem:[%s677_s0 + $0x50] sm:$0xff] }
  0x13   :  { %v41_v5 = vld [vmem:[%s677_s0 + $0xd8] sm:$0xff]  ;;  %v40_v7 = vld [vmem:[%s677_s0 + $0xd0] sm:$0xff]  ;;  %v27_v8 = vld [vmem:[%s677_s0 + $0x68] sm:$0xff] }
  0x14   :  { %v43_v9 = vld [vmem:[%s677_s0 + $0xe8] sm:$0xff]  ;;  %v26_v10 = vld [vmem:[%s677_s0 + $0x60] sm:$0xff]  ;;  %v29_v12 = vld [vmem:[%s677_s0 + $0x78] sm:$0xff] }
  0x15   :  { %366 = vmatpush3.bf16.msra.mxu0 %v365_v33  ;;  %391 = vmatpush3.bf16.msra.mxu1 %v365_v33  ;;  %v42_v11 = vld [vmem:[%s677_s0 + $0xe0] sm:$0xff]  ;;  %v45_v13 = vld [vmem:[%s677_s0 + $0xf8] sm:$0xff]  ;;  %v28_v14 = vld [vmem:[%s677_s0 + $0x70] sm:$0xff] }
  0x16   :  { %368 = vmatprep.subr.bf16.mxu0 %v367_v34  ;;  %384 = vmatprep.subr.bf16.mxu1 %v367_v34  ;;  %v44_v15 = vld [vmem:[%s677_s0 + $0xf0] sm:$0xff]  ;;  %v610_v18 = vld [vmem:[%s678_s2] ss:$0 sm:$0xff] }
  0x19   :  { %370 = vmatpush3.bf16.msra.mxu0 %v369_v39  ;;  %392 = vmatpush3.bf16.msra.mxu1 %v369_v39 }
  0x1a   :  { %372 = vmatprep.subr.bf16.mxu0 %v371_v40  ;;  %385 = vmatprep.subr.bf16.mxu1 %v371_v40 }
  0x1d   :  { %374 = vmatpush3.bf16.msra.mxu0 %v373_v45  ;;  %393 = vmatpush3.bf16.msra.mxu1 %v373_v45 }
  0x1e   :  { %376 = vmatprep.subr.bf16.mxu0 %v375_v46  ;;  %386 = vmatprep.subr.bf16.mxu1 %v375_v46 }
  0x21   :  { %378 = vmatpush3.bf16.msra.mxu0 %v377_v49  ;;  %394 = vmatpush3.bf16.msra.mxu1 %v377_v49 }
  0x24   :  { %150 = vmatmul.mubr.f32.vlgmr.msra.gmra.mrb[0].mxu0 %v14_v50  ;;  %190 = vmatmul.mubr.f32.vlgmr.msra.gmra.mrb[0].mxu1 %v30_v51 }
  0x25   :  { %154 = vmatprep.mubr.f32.mxu0 %v17_v52  ;;  %194 = vmatprep.mubr.f32.mxu1 %v33_v53 }
  0x28   :  { %155 = vmatmul.mubr.f32.gmra.mrb[2].mxu0 %v16_v54  ;;  %195 = vmatmul.mubr.f32.gmra.mrb[2].mxu1 %v32_v55 }
  0x29   :  { %159 = vmatprep.mubr.f32.mxu0 %v19_v56  ;;  %199 = vmatprep.mubr.f32.mxu1 %v35_v57 }
  0x2c   :  { %160 = vmatmul.mubr.f32.gmra.mrb[4].mxu0 %v18_v58  ;;  %200 = vmatmul.mubr.f32.gmra.mrb[4].mxu1 %v34_v59 }
  0x2d   :  { %164 = vmatprep.mubr.f32.mxu0 %v21_v60  ;;  %204 = vmatprep.mubr.f32.mxu1 %v37_v61 }
  0x30   :  { %165 = vmatmul.mubr.f32.gmra.mrb[6].mxu0 %v20_v62  ;;  %205 = vmatmul.mubr.f32.gmra.mrb[6].mxu1 %v36_v63 }
  0x31   :  { %169 = vmatprep.mubr.f32.mxu0 %v23_v0  ;;  %209 = vmatprep.mubr.f32.mxu1 %v39_v1 }
  0x34   :  { %170 = vmatmul.mubr.f32.gmra.mrb[8].mxu0 %v22_v2  ;;  %210 = vmatmul.mubr.f32.gmra.mrb[8].mxu1 %v38_v3 }
  0x35   :  { %174 = vmatprep.mubr.f32.mxu0 %v25_v4  ;;  %214 = vmatprep.mubr.f32.mxu1 %v41_v5 }
  0x38   :  { %175 = vmatmul.mubr.f32.gmra.mrb[10].mxu0 %v24_v6  ;;  %215 = vmatmul.mubr.f32.gmra.mrb[10].mxu1 %v40_v7 }
  0x39   :  { %179 = vmatprep.mubr.f32.mxu0 %v27_v8  ;;  %219 = vmatprep.mubr.f32.mxu1 %v43_v9 }
  0x3c   :  { %180 = vmatmul.mubr.f32.gmra.mrb[12].mxu0 %v26_v10  ;;  %220 = vmatmul.mubr.f32.gmra.mrb[12].mxu1 %v42_v11 }
  0x3d   :  { %184 = vmatprep.mubr.f32.mxu0 %v29_v12  ;;  %224 = vmatprep.mubr.f32.mxu1 %v45_v13 }
  0x40   :  { %185 = vmatmul.mubr.f32.gmra.mrb[14].mxu0 %v28_v14  ;;  %225 = vmatmul.mubr.f32.gmra.mrb[14].mxu1 %v44_v15 }
  0xf7   :  { %v299_v16 = vpop.f32.mrb[0].mxu0  ;;  %v323_v17 = vpop.f32.mrb[0].mxu1 }
  0xf8   :  { %v300_v19 = vpop.f32.mrb[1].mxu0  ;;  %v324_v20 = vpop.f32.mrb[1].mxu1 }
  0xf9   :  { %v301_v21 = vadd.f32 %v300_v19, %v299_v16  ;;  %v325_v22 = vadd.f32 %v324_v20, %v323_v17 }
  0xfb   :  { %v152_v23 = vadd.f32 %v301_v21, %v610_v18  ;;  %v192_v24 = vadd.f32 %v325_v22, %v610_v18  ;;  %v302_v25 = vpop.f32.mrb[2].mxu0  ;;  %v326_v26 = vpop.f32.mrb[2].mxu1 }
  0xfc   :  { %v303_v27 = vpop.f32.mrb[3].mxu0  ;;  %v327_v28 = vpop.f32.mrb[3].mxu1 }
  0xfd   :  { %v230_v29 = vmax.f32 %v152_v23, 0.0  ;;  %v238_v30 = vmax.f32 %v192_v24, 0.0  ;;  %v304_v31 = vadd.f32 %v303_v27, %v302_v25  ;;  %v328_v32 = vadd.f32 %v327_v28, %v326_v26 }
  0xff   :  { %246 = vst [vmem:[%s679_s3] sm:$0xff] %v230_v29  ;;  %254 = vst [vmem:[%s679_s3 + $0x40] sm:$0xff] %v238_v30  ;;  %v157_v33 = vadd.f32 %v304_v31, %v610_v18  ;;  %v197_v34 = vadd.f32 %v328_v32, %v610_v18  ;;  %v305_v35 = vpop.f32.mrb[4].mxu0  ;;  %v329_v36 = vpop.f32.mrb[4].mxu1 }
 0x100   :  { %v306_v37 = vpop.f32.mrb[5].mxu0  ;;  %v330_v38 = vpop.f32.mrb[5].mxu1 }
 0x101   :  { %v231_v39 = vmax.f32 %v157_v33, 0.0  ;;  %v239_v40 = vmax.f32 %v197_v34, 0.0  ;;  %v307_v41 = vadd.f32 %v306_v37, %v305_v35  ;;  %v331_v42 = vadd.f32 %v330_v38, %v329_v36 }
 0x103   :  { %247 = vst [vmem:[%s679_s3 + $0x8] sm:$0xff] %v231_v39  ;;  %255 = vst [vmem:[%s679_s3 + $0x48] sm:$0xff] %v239_v40  ;;  %v162_v43 = vadd.f32 %v307_v41, %v610_v18  ;;  %v202_v44 = vadd.f32 %v331_v42, %v610_v18  ;;  %v308_v45 = vpop.f32.mrb[6].mxu0  ;;  %v332_v46 = vpop.f32.mrb[6].mxu1 }
 0x104   :  { %v309_v47 = vpop.f32.mrb[7].mxu0  ;;  %v333_v48 = vpop.f32.mrb[7].mxu1 }
 0x105   :  { %v232_v49 = vmax.f32 %v162_v43, 0.0  ;;  %v240_v50 = vmax.f32 %v202_v44, 0.0  ;;  %v310_v51 = vadd.f32 %v309_v47, %v308_v45  ;;  %v334_v52 = vadd.f32 %v333_v48, %v332_v46 }
 0x107   :  { %248 = vst [vmem:[%s679_s3 + $0x10] sm:$0xff] %v232_v49  ;;  %256 = vst [vmem:[%s679_s3 + $0x50] sm:$0xff] %v240_v50  ;;  %v167_v53 = vadd.f32 %v310_v51, %v610_v18  ;;  %v207_v54 = vadd.f32 %v334_v52, %v610_v18  ;;  %v311_v55 = vpop.f32.mrb[8].mxu0  ;;  %v335_v56 = vpop.f32.mrb[8].mxu1 }
 0x108   :  { %v312_v57 = vpop.f32.mrb[9].mxu0  ;;  %v336_v58 = vpop.f32.mrb[9].mxu1 }
 0x109   :  { %v233_v59 = vmax.f32 %v167_v53, 0.0  ;;  %v241_v60 = vmax.f32 %v207_v54, 0.0  ;;  %v313_v61 = vadd.f32 %v312_v57, %v311_v55  ;;  %v337_v62 = vadd.f32 %v336_v58, %v335_v56 }
 0x10b   :  { %249 = vst [vmem:[%s679_s3 + $0x18] sm:$0xff] %v233_v59  ;;  %257 = vst [vmem:[%s679_s3 + $0x58] sm:$0xff] %v241_v60  ;;  %v172_v63 = vadd.f32 %v313_v61, %v610_v18  ;;  %v212_v0 = vadd.f32 %v337_v62, %v610_v18  ;;  %v314_v1 = vpop.f32.mrb[10].mxu0  ;;  %v338_v2 = vpop.f32.mrb[10].mxu1 }
 0x10c   :  { %v315_v3 = vpop.f32.mrb[11].mxu0  ;;  %v339_v4 = vpop.f32.mrb[11].mxu1 }
 0x10d   :  { %v234_v5 = vmax.f32 %v172_v63, 0.0  ;;  %v242_v6 = vmax.f32 %v212_v0, 0.0  ;;  %v316_v7 = vadd.f32 %v315_v3, %v314_v1  ;;  %v340_v8 = vadd.f32 %v339_v4, %v338_v2 }
 0x10f   :  { %250 = vst [vmem:[%s679_s3 + $0x20] sm:$0xff] %v234_v5  ;;  %258 = vst [vmem:[%s679_s3 + $0x60] sm:$0xff] %v242_v6  ;;  %v177_v9 = vadd.f32 %v316_v7, %v610_v18  ;;  %v217_v10 = vadd.f32 %v340_v8, %v610_v18  ;;  %v317_v11 = vpop.f32.mrb[12].mxu0  ;;  %v341_v12 = vpop.f32.mrb[12].mxu1 }
 0x110   :  { %v318_v13 = vpop.f32.mrb[13].mxu0  ;;  %v342_v14 = vpop.f32.mrb[13].mxu1 }
 0x111   :  { %v235_v15 = vmax.f32 %v177_v9, 0.0  ;;  %v243_v16 = vmax.f32 %v217_v10, 0.0  ;;  %v319_v17 = vadd.f32 %v318_v13, %v317_v11  ;;  %v343_v19 = vadd.f32 %v342_v14, %v341_v12 }
 0x113   :  { %251 = vst [vmem:[%s679_s3 + $0x28] sm:$0xff] %v235_v15  ;;  %259 = vst [vmem:[%s679_s3 + $0x68] sm:$0xff] %v243_v16  ;;  %v182_v20 = vadd.f32 %v319_v17, %v610_v18  ;;  %v222_v21 = vadd.f32 %v343_v19, %v610_v18  ;;  %v320_v22 = vpop.f32.mrb[14].mxu0  ;;  %v344_v23 = vpop.f32.mrb[14].mxu1 }
 0x114   :  { %v321_v24 = vpop.f32.mrb[15].mxu0  ;;  %v345_v25 = vpop.f32.mrb[15].mxu1 }
 0x115   :  { %v236_v26 = vmax.f32 %v182_v20, 0.0  ;;  %v244_v27 = vmax.f32 %v222_v21, 0.0  ;;  %v322_v28 = vadd.f32 %v321_v24, %v320_v22  ;;  %v346_v29 = vadd.f32 %v345_v25, %v344_v23 }
 0x117   :  { %252 = vst [vmem:[%s679_s3 + $0x30] sm:$0xff] %v236_v26  ;;  %260 = vst [vmem:[%s679_s3 + $0x70] sm:$0xff] %v244_v27  ;;  %v187_v30 = vadd.f32 %v322_v28, %v610_v18  ;;  %v227_v31 = vadd.f32 %v346_v29, %v610_v18 }
 0x119   :  { %v237_v32 = vmax.f32 %v187_v30, 0.0  ;;  %v245_v33 = vmax.f32 %v227_v31, 0.0 }
 0x11b   :  { %253 = vst [vmem:[%s679_s3 + $0x38] sm:$0xff] %v237_v32  ;;  %261 = vst [vmem:[%s679_s3 + $0x78] sm:$0xff] %v245_v33 }

// kernel: net_forward.5
= control target key start
LH: loop header
LB: loop body
LE: loop exit
PB: predicated region body
PF: predicated region fallthrough
CT: control target
= control target key end

     0   :  { %v74_v3 = vlaneseq  ;;  %v573_v8 = vmov 0.0|0.0   ;;  %v574_v9 = vmov 1983009808   ;;  %vm575_vm0 = vmmov 0   ;;  %s813_s0 = inlined_call_operand.vmem [shape: f32[2,320], index: 0, kind: input, shape index: {}]   ;;  %s814_s1 = inlined_call_operand.vmem [shape: f32[320,128], index: 1, kind: input, shape index: {}]   ;;  %s815_s2 = inlined_call_operand.vmem [shape: f32[1,128], index: 2, kind: input, shape index: {}]   ;;  %s816_s3 = inlined_call_operand.vmem [shape: f32[128,128], index: 3, kind: input, shape index: {}]   ;;  %s817_s4 = inlined_call_operand.vmem [shape: f32[1,128], index: 4, kind: input, shape index: {}]   ;;  %s818_s5 = inlined_call_operand.hbm [shape: f32[2,128], index: 5, kind: output, shape index: {}]  }
   0x1   :  { %v38_v0 = vld [vmem:[%s814_s1 + $0x80] sm:$0xff]  ;;  %v39_v1 = vld [vmem:[%s814_s1 + $0x88] sm:$0xff]  ;;  %v40_v6 = vld [vmem:[%s814_s1 + $0x90] sm:$0xff]  ;;  %503 = vmatprep.subr.bf16.mxu1 %v573_v8  ;;  %v72_v10 = vunpack.c.l.s4 %v574_v9  ;;  %v576_v16 = vmov 0.0  }
   0x2   :  { %v22_v2 = vld [vmem:[%s814_s1] sm:$0xff]  ;;  %v471_v4 = vpack.c.bf16 %v39_v1, %v38_v0  ;;  %v23_v5 = vld [vmem:[%s814_s1 + $0x8] sm:$0xff]  ;;  %v41_v7 = vld [vmem:[%s814_s1 + $0x98] sm:$0xff]  ;;  %433 = vmatprep.mubr.msk.f32.mxu1 %vm575_vm0, %v576_v16  ;;  %v75_v23 = vshrl.u32 %v74_v3, 7 }
   0x3   :  { %v473_v11 = vpack.c.bf16 %v23_v5, %v22_v2  ;;  %v475_v12 = vpack.c.bf16 %v41_v7, %v40_v6  ;;  %v24_v13 = vld [vmem:[%s814_s1 + $0x10] sm:$0xff]  ;;  %v25_v14 = vld [vmem:[%s814_s1 + $0x18] sm:$0xff]  ;;  %v42_v15 = vld [vmem:[%s814_s1 + $0xa0] sm:$0xff]  ;;  %v73_v22 = vunpack.c.0.s8 %v72_v10 }
   0x4   :  { %472 = vmatprep.subr.bf16.mxu0 %v471_v4  ;;  %v43_v17 = vld [vmem:[%s814_s1 + $0xa8] sm:$0xff]  ;;  %v477_v18 = vpack.c.bf16 %v25_v14, %v24_v13  ;;  %v26_v20 = vld [vmem:[%s814_s1 + $0x20] sm:$0xff]  ;;  %v44_v24 = vld [vmem:[%s814_s1 + $0xb0] sm:$0xff] }
   0x5   :  { %474 = vmatpush3.bf16.msra.mxu0 %v473_v11  ;;  %v479_v19 = vpack.c.bf16 %v43_v17, %v42_v15  ;;  %v27_v21 = vld [vmem:[%s814_s1 + $0x28] sm:$0xff]  ;;  %v45_v25 = vld [vmem:[%s814_s1 + $0xb8] sm:$0xff]  ;;  %v54_v27 = vld [vmem:[%s814_s1 + $0x100] sm:$0xff]  ;;  %v76_v34 = vsub.s32 %v73_v22, %v75_v23 }
   0x6   :  { %476 = vmatprep.subr.bf16.mxu0 %v475_v12  ;;  %v481_v26 = vpack.c.bf16 %v27_v21, %v26_v20  ;;  %v55_v28 = vld [vmem:[%s814_s1 + $0x108] sm:$0xff]  ;;  %v483_v29 = vpack.c.bf16 %v45_v25, %v44_v24  ;;  %v28_v30 = vld [vmem:[%s814_s1 + $0x30] sm:$0xff]  ;;  %v29_v31 = vld [vmem:[%s814_s1 + $0x38] sm:$0xff] }
   0x7   :  { %v46_v32 = vld [vmem:[%s814_s1 + $0xc0] sm:$0xff]  ;;  %v504_v33 = vpack.c.bf16 %v55_v28, %v54_v27  ;;  %v47_v35 = vld [vmem:[%s814_s1 + $0xc8] sm:$0xff]  ;;  %v56_v36 = vld [vmem:[%s814_s1 + $0x110] sm:$0xff]  ;;  %v485_v39 = vpack.c.bf16 %v29_v31, %v28_v30 }
   0x8   :  { %v57_v37 = vld [vmem:[%s814_s1 + $0x118] sm:$0xff]  ;;  %v58_v40 = vld [vmem:[%s814_s1 + $0x120] sm:$0xff]  ;;  %v59_v41 = vld [vmem:[%s814_s1 + $0x128] sm:$0xff]  ;;  %v487_v43 = vpack.c.bf16 %v47_v35, %v46_v32 }
   0x9   :  { %478 = vmatpush3.bf16.msra.mxu0 %v477_v18  ;;  %505 = vmatpush3.bf16.msra.mxu1 %v504_v33  ;;  %v507_v38 = vpack.c.bf16 %v57_v37, %v56_v36  ;;  %v21_v42 = vld [vmem:[%s813_s0] sm:$0x3f]  ;;  %v31_v45 = vld [vmem:[%s814_s1 + $0x48] sm:$0xff]  ;;  %v48_v47 = vld [vmem:[%s814_s1 + $0xd0] sm:$0xff]  ;;  %v510_v49 = vpack.c.bf16 %v59_v41, %v58_v40 }
   0xa   :  { %480 = vmatprep.subr.bf16.mxu0 %v479_v19  ;;  %506 = vmatprep.subr.bf16.mxu1 %v573_v8  ;;  %v30_v44 = vld [vmem:[%s814_s1 + $0x40] sm:$0xff]  ;;  %v77_v46 = vrot.slane %v21_v42, %v76_v34  ;;  %v49_v48 = vld [vmem:[%s814_s1 + $0xd8] sm:$0xff]  ;;  %v60_v52 = vld [vmem:[%s814_s1 + $0x130] sm:$0xff] }
   0xb   :  { %v489_v51 = vpack.c.bf16 %v31_v45, %v30_v44  ;;  %v61_v53 = vld [vmem:[%s814_s1 + $0x138] sm:$0xff]  ;;  %v491_v54 = vpack.c.bf16 %v49_v48, %v48_v47  ;;  %v32_v55 = vld [vmem:[%s814_s1 + $0x50] sm:$0xff] }
   0xc   :  { %v85_v50 = vcombine.high %v77_v46, %v77_v46  ;;  %v33_v56 = vld [vmem:[%s814_s1 + $0x58] sm:$0xff] }
   0xd   :  { %482 = vmatpush3.bf16.msra.mxu0 %v481_v26  ;;  %508 = vmatpush3.bf16.msra.mxu1 %v507_v38 }
   0xe   :  { %484 = vmatprep.subr.bf16.mxu0 %v483_v29  ;;  %509 = vmatprep.subr.bf16.mxu1 %v573_v8 }
   0xf   :  { %155 = vmatprep.mubr.f32.mxu0 %v85_v50 }
  0x11   :  { %486 = vmatpush3.bf16.msra.mxu0 %v485_v39 }
  0x12   :  { %488 = vmatprep.subr.bf16.mxu0 %v487_v43 }
  0x13   :  { %10 = vsyncpa [#allocation3], 0  ;;  %v50_v57 = vld [vmem:[%s814_s1 + $0xe0] sm:$0xff]  ;;  %v51_v58 = vld [vmem:[%s814_s1 + $0xe8] sm:$0xff]  ;;  %v70_v59 = vcombine.high %v21_v42, %v21_v42  ;;  %511 = vmatpush3.bf16.msra.mxu1 %v510_v49  ;;  %v513_v60 = vpack.c.bf16 %v61_v53, %v60_v52  ;;  %v493_v61 = vpack.c.bf16 %v33_v56, %v32_v55  ;;  %vm88_vm1 = vcmask 523264  }
  0x14   :  { %512 = vmatprep.subr.bf16.mxu1 %v573_v8  ;;  %v232_v62 = vld [vmem:[%s816_s3] sm:$0xff]  ;;  %v233_v63 = vld [vmem:[%s816_s3 + $0x8] sm:$0xff]  ;;  %v495_v0 = vpack.c.bf16 %v51_v58, %v50_v57  ;;  %v52_v3 = vld [vmem:[%s814_s1 + $0xf0] sm:$0xff]  ;;  %vm325_vm2 = vcmask 1041408  }
  0x15   :  { %490 = vmatpush3.bf16.msra.mxu0 %v489_v51  ;;  %v34_v1 = vld [vmem:[%s814_s1 + $0x60] sm:$0xff]  ;;  %v35_v2 = vld [vmem:[%s814_s1 + $0x68] sm:$0xff]  ;;  %v53_v4 = vld [vmem:[%s814_s1 + $0xf8] sm:$0xff]  ;;  %v84_v5 = vrot.slane %v70_v59, %v76_v34  ;;  %v516_v6 = vpack.c.bf16 %v233_v63, %v232_v62 }
  0x16   :  { %492 = vmatprep.subr.bf16.mxu0 %v491_v54  ;;  %v497_v7 = vpack.c.bf16 %v35_v2, %v34_v1  ;;  %v234_v9 = vld [vmem:[%s816_s3 + $0x10] sm:$0xff]  ;;  %v235_v10 = vld [vmem:[%s816_s3 + $0x18] sm:$0xff]  ;;  %v499_v11 = vpack.c.bf16 %v53_v4, %v52_v3  ;;  %v236_v17 = vld [vmem:[%s816_s3 + $0x20] sm:$0xff] }
  0x17   :  { %514 = vmatpush3.bf16.msra.mxu1 %v513_v60  ;;  %v36_v12 = vld [vmem:[%s814_s1 + $0x70] sm:$0xff]  ;;  %v37_v13 = vld [vmem:[%s814_s1 + $0x78] sm:$0xff]  ;;  %v519_v14 = vpack.c.bf16 %v235_v10, %v234_v9  ;;  %v237_v18 = vld [vmem:[%s816_s3 + $0x28] sm:$0xff] }
  0x18   :  { %515 = vmatprep.subr.bf16.mxu1 %v573_v8  ;;  %v501_v15 = vpack.c.bf16 %v37_v13, %v36_v12  ;;  %v522_v19 = vpack.c.bf16 %v237_v18, %v236_v17  ;;  %v239_v20 = vld [vmem:[%s816_s3 + $0x38] sm:$0xff]  ;;  %v240_v22 = vld [vmem:[%s816_s3 + $0x40] sm:$0xff]  ;;  %v241_v23 = vld [vmem:[%s816_s3 + $0x48] sm:$0xff] }
  0x19   :  { %494 = vmatpush3.bf16.msra.mxu0 %v493_v61  ;;  %v528_v24 = vpack.c.bf16 %v241_v23, %v240_v22  ;;  %v242_v25 = vld [vmem:[%s816_s3 + $0x50] sm:$0xff]  ;;  %v243_v26 = vld [vmem:[%s816_s3 + $0x58] sm:$0xff]  ;;  %v244_v28 = vld [vmem:[%s816_s3 + $0x60] sm:$0xff] }
  0x1a   :  { %496 = vmatprep.subr.bf16.mxu0 %v495_v0  ;;  %434 = vmatmul.mubr.msk.f32.vlgmr.msra.gmra.mrb[0].mxu1 %vm88_vm1, %v84_v5  ;;  %v531_v27 = vpack.c.bf16 %v243_v26, %v242_v25  ;;  %v245_v29 = vld [vmem:[%s816_s3 + $0x68] sm:$0xff]  ;;  %v246_v31 = vld [vmem:[%s816_s3 + $0x70] sm:$0xff]  ;;  %v247_v32 = vld [vmem:[%s816_s3 + $0x78] sm:$0xff] }
  0x1b   :  { %517 = vmatpush3.bf16.msra.mxu1 %v516_v6  ;;  %468 = vmatprep.mubr.msk.f32.mxu1 %vm575_vm0, %v576_v16  ;;  %v238_v16 = vld [vmem:[%s816_s3 + $0x30] sm:$0xff]  ;;  %v534_v30 = vpack.c.bf16 %v245_v29, %v244_v28  ;;  %v537_v33 = vpack.c.bf16 %v247_v32, %v246_v31  ;;  %v353_v38 = vld [vmem:[%s815_s2] ss:$0 sm:$0xff]  ;;  %s577_s2 = smov [#allocation2]  }
  0x1c   :  { %518 = vmatprep.subr.bf16.mxu1 %v573_v8  ;;  %v525_v21 = vpack.c.bf16 %v239_v20, %v238_v16  ;;  %v355_v42 = vld [vmem:[%s817_s4] ss:$0 sm:$0xff]  ;;  %s345_s3 = sshll.u32 %s577_s2, 4  ;;  %s346_s3 = int_to_ptr.vmem [resolvable:$true] %s345_s3 }
  0x1d   :  { %498 = vmatpush3.bf16.msra.mxu0 %v497_v7  ;;  %s549_s4 = scalar_lea.vmem %s346_s3, 32  ;;  %p554_p1 = scmp.lt.s32.totalorder %s346_s3, %s346_s3 }
  0x1e   :  { %500 = vmatprep.subr.bf16.mxu0 %v499_v11  ;;  %p550_p0 = scmp.ne.s32.totalorder %s346_s3, %s549_s4  ;;  %p555_p2 = scmp.lt.s32.totalorder %s549_s4, %s549_s4 }
  0x1f   :  { %520 = vmatpush3.bf16.msra.mxu1 %v519_v14 }
  0x20   :  { %521 = vmatprep.subr.bf16.mxu1 %v573_v8  ;;  %p556_p3 = por %p555_p2, %p554_p1 }
  0x21   :  { %502 = vmatpush3.bf16.msra.mxu0 %v501_v15 }
  0x22   :  { %p557_p4 = pnand %p556_p3, %p550_p0 }
  0x23   :  { %523 = vmatpush3.bf16.msra.mxu1 %v522_v19 }
  0x24   :  { %156 = vmatmul.mubr.f32.vlgmr.msra.gmra.mrb[0].mxu0 %v77_v46  ;;  %524 = vmatprep.subr.bf16.mxu1 %v573_v8 }
  0x27   :  { %526 = vmatpush3.bf16.msra.mxu1 %v525_v21 }
  0x28   :  { %527 = vmatprep.subr.bf16.mxu1 %v573_v8 }
  0x2b   :  { %529 = vmatpush3.bf16.msra.mxu1 %v528_v24 }
  0x2c   :  { %530 = vmatprep.subr.bf16.mxu1 %v573_v8 }
  0x2f   :  { %532 = vmatpush3.bf16.msra.mxu1 %v531_v27 }
  0x30   :  { %533 = vmatprep.subr.bf16.mxu1 %v573_v8 }
  0x33   :  { %535 = vmatpush3.bf16.msra.mxu1 %v534_v30 }
  0x34   :  { %536 = vmatprep.subr.bf16.mxu1 %v573_v8 }
  0x37   :  { %538 = vmatpush3.bf16.msra.mxu1 %v537_v33 }
  0xed   :  { %v227_v34 = vpop.f32.mrb[0].mxu1 }
  0xee   :  { %v435_v35 = vpop.f32.mrb[1].mxu1 }
  0xf7   :  { %v388_v36 = vpop.f32.mrb[0].mxu0 }
  0xf8   :  { %v389_v37 = vpop.f32.mrb[1].mxu0 }
  0xf9   :  { %v390_v39 = vadd.f32 %v389_v37, %v388_v36 }
  0xfb   :  { %v158_v8 = vadd.f32 %v390_v39, %v353_v38 }
  0xfd   :  { %v228_v40 = vadd.f32 %v227_v34, %v158_v8 }
  0xff   :  { %v231_v41 = vmax.f32 %v228_v40, 0.0 }
 0x101   :  { %469 = vmatmul.mubr.f32.vlgmr.msra.gmra.mrb[2].mxu1 %v231_v41 }
 0x1d4   :  { %v321_v43 = vpop.f32.mrb[2].mxu1 }
 0x1d5   :  { %v322_v44 = vadd.f32 %v355_v42, %v321_v43  ;;  %v470_v45 = vpop.f32.mrb[3].mxu1 }
 0x1d7   :  { %v326_v46 = vsel %vm325_vm2, %v322_v44, -inf }
 0x1d8   :  { %327 = vmax.xlane.f32.xlu0 %v326_v46 }
 0x265   :  { %v328_v47 = vpop.xlane.xlu0 %327 }
 0x266   :  { %v329_v48 = vsub.f32 %v322_v44, %v328_v47 }
 0x268   :  { %v330_v49 = vmul.f32 1.442695, %v329_v48 }
 0x26a   :  { %545 = vpow2.f32 %v330_v49 }
 0x274   :  { %v546_v50 = vpop.eup %545 }
 0x275   :  { %v332_v51 = vsel %vm325_vm2, %v546_v50, 0.0 }
 0x276   :  { %333 = vadd.xlane.f32.xlu0 %v332_v51 }
 0x303   :  { %v334_v52 = vpop.xlane.xlu0 %333 }
 0x304   :  { %547 = vlog2.f32 %v334_v52 }
 0x30e   :  { %v548_v53 = vpop.eup %547 }
 0x30f   :  { %v336_v54 = vmul.f32 0.6931472, %v548_v53 }
 0x311   :  { %v337_v55 = vsub.f32 %v329_v48, %v336_v54 }
 0x313   :  { %338 = vst [vmem:[#allocation2] sm:$0x3] %v337_v55 }
 0x314   :  { %560 = shalt.err (!%p557_p4)
}
 0x315   :  { %s561_s9 = scalar_lea.hbm %s818_s5, 32 }
 0x316   :  { %p562_p5 = scmp.ne.s32.totalorder %s818_s5, %s561_s9  ;;  %p565_p6 = scmp.lt.u32.totalorder %s561_s9, %s818_s5 }
 0x318   :  { %p567_p7 = pnand %p565_p6, %p562_p5 }
 0x31a   :  { %570 = shalt.err (!%p567_p7)
}
 0x31b   :  { %348 = dma.vmem_to_hbm [thread:$0]  %s346_s3, 32, %s818_s5, [#allocation3]  }
 0x31c   :  { %571 = dma.done.wait [#allocation3], 32  }
 0x31d   :  { %572 = vsyncadd [#allocation3], 4294967264 }
 0x31e   :  { %352 = vsyncpa [#allocation3], 1 }

</bundles_post_ra>
